<compile_context>
chip_gen: v6e
topology: v6e:2x2x1
jax: 0.10.0
libtpu: 0.0.40
codegen_flags: <defaults>
</compile_context>

<pallas_src>
import jax
import jax.numpy as jnp
from jax.experimental import pallas as pl
from jax.experimental.pallas import tpu as pltpu

W_D = 25.0          # module default w_d
W_A = 50.0          # module default w_a
EPS_PDIST = 1e-12   # clamp eps in pdist
EPS_NORM = 1e-12    # F.normalize default eps

# Budget for the pipelined input blocks: 2 inputs * 2 buffers * (B, tile_d).
# 8 MiB fits v5e's 16 MiB scoped-VMEM default (and v6e/v7x 32 MiB) flag-free.
_INPUT_BUF_BUDGET = 8 * 1024 * 1024


def _smooth_l1(x):
    # F.smooth_l1_loss elementwise term, beta=1.0 (PyTorch default)
    ax = jnp.abs(x)
    return jnp.where(ax < 1.0, 0.5 * x * x, ax - 0.5)


def _make_rkd_kernel(B, tile_d, num_k, rem, precision):
    """Kernel over grid (num_k,): accumulate the two Grams, finalize on the last step."""

    def kernel(s_ref, t_ref, o_ref, gs_ref, gt_ref):
        k = pl.program_id(0)

        @pl.when(k == 0)
        def _():
            gs_ref[...] = jnp.zeros_like(gs_ref)
            gt_ref[...] = jnp.zeros_like(gt_ref)

        s_blk = s_ref[...]
        t_blk = t_ref[...]
        if rem != tile_d:  # static: only emitted when a ragged tail exists
            # The last block hangs over the end of D; the out-of-range lanes
            # are unspecified, so zero them before the matmul (replaces a
            # wrapper-side jnp.pad that re-streamed both tensors through HBM).
            lane = jax.lax.broadcasted_iota(jnp.int32, (B, tile_d), 1)
            limit = jnp.where(k == num_k - 1, rem, tile_d)
            keep = lane < limit
            s_blk = jnp.where(keep, s_blk, jnp.zeros_like(s_blk))
            t_blk = jnp.where(keep, t_blk, jnp.zeros_like(t_blk))

        # Two (B,B) Grams; ((1,),(1,)) contraction is the native transposed-RHS
        # MXU form (same lowering as jnp.dot(a, b.T)) -> no full-tile transpose.
        dn = (((1,), (1,)), ((), ()))
        gs_ref[...] += jax.lax.dot_general(
            s_blk, s_blk, dimension_numbers=dn,
            preferred_element_type=jnp.float32, precision=precision)
        gt_ref[...] += jax.lax.dot_general(
            t_blk, t_blk, dimension_numbers=dn,
            preferred_element_type=jnp.float32, precision=precision)

        @pl.when(k == num_k - 1)
        def _():
            Gs = gs_ref[...]          # (B, B) f32 student Gram
            Gt = gt_ref[...]          # (B, B) f32 teacher Gram

            r = jax.lax.broadcasted_iota(jnp.int32, (B, B), 0)
            c = jax.lax.broadcasted_iota(jnp.int32, (B, B), 1)
            eye = r == c

            # -------- distance term (pdist from the Gram) --------
            def dist_and_diag(G):
                diag_col = jnp.sum(jnp.where(eye, G, 0.0), axis=1, keepdims=True)  # (B,1)
                diag_row = jnp.sum(jnp.where(eye, G, 0.0), axis=0, keepdims=True)  # (1,B)
                res = jnp.sqrt(jnp.maximum(diag_col + diag_row - 2.0 * G, EPS_PDIST))
                res = jnp.where(eye, 0.0, res)                     # zero diagonal
                mask = (res > 0.0).astype(jnp.float32)             # pytorch: d[d > 0]
                mean = jnp.sum(res * mask) / jnp.sum(mask)
                return res / mean, diag_col, diag_row

            d_s, dcol_s, drow_s = dist_and_diag(Gs)
            d_t, dcol_t, drow_t = dist_and_diag(Gt)
            loss_d = jnp.mean(_smooth_l1(d_s - d_t))

            # -------- angle term (cosines from the Gram, per anchor i) --------
            def angle_cos(G, dcol, drow, i):
                gii = dcol[i:i + 1, 0:1]                # (1,1) = G[i,i]
                gcol = G[:, i:i + 1]                    # (B,1) = G[:,i]
                grow = G[i:i + 1, :]                    # (1,B) = G[i,:]
                # ||x_j - x_i||^2 (clamped >= 0 against f32 cancellation)
                nsq_c = jnp.maximum(dcol + gii - 2.0 * gcol, 0.0)   # (B,1)
                nsq_r = jnp.maximum(drow + gii - 2.0 * grow, 0.0)   # (1,B)
                inv_c = 1.0 / jnp.maximum(jnp.sqrt(nsq_c), EPS_NORM)  # F.normalize eps
                inv_r = 1.0 / jnp.maximum(jnp.sqrt(nsq_r), EPS_NORM)
                num = G - gcol - grow + gii             # <x_j-x_i, x_k-x_i>
                cosm = num * inv_c * inv_r
                # rows j==i / cols k==i are exact zero vectors after normalize
                mask = (r != i) & (c != i)
                return jnp.where(mask, cosm, 0.0)

            # TODO(synk): for large B (>~64) vectorize this per-anchor loop
            # ((B,B,B) broadcast) or chunk it; for small static B it is a
            # negligible one-shot epilogue on (B,B) VPU data.
            acc = jnp.float32(0.0)
            for i in range(B):                          # B small & static -> unrolled
                cs = angle_cos(Gs, dcol_s, drow_s, i)
                ct = angle_cos(Gt, dcol_t, drow_t, i)
                acc = acc + jnp.sum(_smooth_l1(cs - ct))
            loss_a = acc / jnp.float32(B * B * B)

            o_ref[0, 0] = W_D * loss_d + W_A * loss_a

    return kernel


def rkd_loss(f_s, f_t, input_buf_budget=_INPUT_BUF_BUDGET):
    B = f_s.shape[0]
    s = f_s.reshape(B, -1)          # native dtype; no wrapper-side astype / pad
    t = f_t.reshape(B, -1)
    D = s.shape[1]
    itemsize = jnp.dtype(s.dtype).itemsize

    # Largest D-tile keeping 2 inputs x 2 pipeline buffers under budget,
    # floored to a lane multiple (128).
    tile_cap = max(128, (input_buf_budget // (4 * B * itemsize)) // 128 * 128)
    tile_d = D if D <= tile_cap else tile_cap   # full block when it fits
    num_k = pl.cdiv(D, tile_d)
    rem = D - (num_k - 1) * tile_d              # valid lanes in the last block

    # Cancellation-prone Gram reconstruction -> full f32 MXU passes for f32
    # inputs (kernel is HBM-bound, MXU slack makes this free).
    precision = jax.lax.Precision.HIGHEST if s.dtype == jnp.float32 else None

    cost = pl.CostEstimate(
        flops=int(4 * B * B * D),              # two BxD Gram matmuls
        transcendentals=int(4 * B * B),        # sqrt / rsqrt in the finalize
        bytes_accessed=int(2 * B * D * itemsize + 4))

    out = pl.pallas_call(
        _make_rkd_kernel(B, tile_d, num_k, rem, precision),
        out_shape=jax.ShapeDtypeStruct((1, 1), jnp.float32),
        grid=(num_k,),
        in_specs=[
            pl.BlockSpec((B, tile_d), lambda k: (0, k)),   # student D-tile
            pl.BlockSpec((B, tile_d), lambda k: (0, k)),   # teacher D-tile
        ],
        out_specs=pl.BlockSpec(memory_space=pltpu.SMEM),   # scalar result
        scratch_shapes=[pltpu.VMEM((B, B), jnp.float32),   # student Gram acc
                        pltpu.VMEM((B, B), jnp.float32)],  # teacher Gram acc
        compiler_params=pltpu.CompilerParams(
            dimension_semantics=("arbitrary",)),           # D axis is a reduction
        cost_estimate=cost,
        # TODO(synk): v7x-only 2-TensorCore split of the D axis (leading
        # "parallel" axis with partial-Gram outputs + tiny epilogue).
    )(s, t)
    return out[0, 0]


def rkd_reference(f_s, f_t):
    """Plain-JAX mirror of the PyTorch RKDLoss for a sanity check."""
    B = f_s.shape[0]
    s = f_s.reshape(B, -1).astype(jnp.float32)
    t = f_t.reshape(B, -1).astype(jnp.float32)
    hi = jax.lax.Precision.HIGHEST

    def pdist(e):
        sq = jnp.sum(e * e, axis=1)
        prod = jnp.dot(e, e.T, precision=hi)
        res = jnp.sqrt(jnp.clip(sq[:, None] + sq[None, :] - 2.0 * prod, 1e-12, None))
        return res * (1.0 - jnp.eye(B, dtype=res.dtype))

    def norm_mean(dm):
        mask = dm > 0
        return dm / (jnp.sum(jnp.where(mask, dm, 0.0)) / jnp.sum(mask))

    sl1 = lambda x: jnp.where(jnp.abs(x) < 1.0, 0.5 * x * x, jnp.abs(x) - 0.5)
    loss_d = jnp.mean(sl1(norm_mean(pdist(s)) - norm_mean(pdist(t))))

    def angles(e):
        diff = e[None, :, :] - e[:, None, :]               # diff[i,j] = e[j] - e[i]
        n = jnp.sqrt(jnp.sum(diff * diff, axis=2, keepdims=True))
        nd = diff / jnp.maximum(n, 1e-12)
        return jnp.einsum('ijd,ikd->ijk', nd, nd, precision=hi)

    loss_a = jnp.mean(sl1(angles(s) - angles(t)))
    return W_D * loss_d + W_A * loss_a


if __name__ == "__main__":
    key = jax.random.PRNGKey(0)
    k_s, k_t, k_s2, k_t2 = jax.random.split(key, 4)

    # Case 1: small NCHW features, D = 256 (single-block path).
    f_s = jax.random.normal(k_s, (8, 4, 8, 8), dtype=jnp.float32)
    f_t = jax.random.normal(k_t, (8, 4, 8, 8), dtype=jnp.float32)
    loss = jax.block_until_ready(rkd_loss(f_s, f_t))
    ref = jax.block_until_ready(rkd_reference(f_s, f_t))
    assert jnp.isfinite(loss)
    assert jnp.allclose(loss, ref, rtol=1e-2, atol=1e-2), (loss, ref)

    # Case 2: D = 300 with a tiny tile budget -> exercises the multi-step
    # reduction grid and the padding-free tail-lane masking.
    f_s2 = jax.random.normal(k_s2, (8, 3, 10, 10), dtype=jnp.float32)
    f_t2 = jax.random.normal(k_t2, (8, 3, 10, 10), dtype=jnp.float32)
    loss2 = jax.block_until_ready(
        rkd_loss(f_s2, f_t2, input_buf_budget=128 * 8 * 4 * 4))
    ref2 = jax.block_until_ready(rkd_reference(f_s2, f_t2))
    assert jnp.isfinite(loss2)
    assert jnp.allclose(loss2, ref2, rtol=1e-2, atol=1e-2), (loss2, ref2)

    print("KERNEL_OK")
</pallas_src>

<mosaic_0001>
module attributes {stable_mosaic.version = 11 : i64} {
  func.func @kernel(%arg0: i32, %arg1: memref<8x256xf32, #tpu.memory_space<vmem>>, %arg2: memref<8x256xf32, #tpu.memory_space<vmem>>, %arg3: memref<1x1xf32, #tpu.memory_space<smem>>, %arg4: memref<8x8xf32, #tpu.memory_space<vmem>>, %arg5: memref<8x8xf32, #tpu.memory_space<vmem>>) attributes {dimension_semantics = [#tpu.dimension_semantics<arbitrary>], iteration_bounds = array<i64: 1>, scalar_prefetch = 0 : i64, scratch_operands = 2 : i64, tpu.core_type = #tpu.core_type<tc>, window_params = [{transform_indices = @transform_0, window_bounds = array<i64: 8, 256>}, {transform_indices = @transform_1, window_bounds = array<i64: 8, 256>}, {transform_indices = @transform_2, window_bounds = array<i64: 1, 1>}]} {
    %c0_i32 = arith.constant 0 : i32
    %0 = arith.cmpi eq, %arg0, %c0_i32 : i32
    %1 = arith.extui %0 : i1 to i32
    %c0_i32_0 = arith.constant 0 : i32
    %2 = arith.cmpi ne, %1, %c0_i32_0 : i32
    scf.if %2 {
      %cst_15 = arith.constant 0.000000e+00 : f32
      %16 = vector.broadcast %cst_15 : f32 to vector<8x8xf32>
      %c0_16 = arith.constant 0 : index
      %c0_17 = arith.constant 0 : index
      %17 = vector.load %arg4[%c0_16, %c0_17] : memref<8x8xf32, #tpu.memory_space<vmem>>, vector<8x8xf32>
      tpu.vector_store %arg4[%c0_16, %c0_17], %16 {strides = array<i32>} : memref<8x8xf32, #tpu.memory_space<vmem>>, vector<8x8xf32>,
      %cst_18 = arith.constant 0.000000e+00 : f32
      %18 = vector.broadcast %cst_18 : f32 to vector<8x8xf32>
      %c0_19 = arith.constant 0 : index
      %c0_20 = arith.constant 0 : index
      %19 = vector.load %arg5[%c0_19, %c0_20] : memref<8x8xf32, #tpu.memory_space<vmem>>, vector<8x8xf32>
      tpu.vector_store %arg5[%c0_19, %c0_20], %18 {strides = array<i32>} : memref<8x8xf32, #tpu.memory_space<vmem>>, vector<8x8xf32>,
    } else {
    }
    %c0 = arith.constant 0 : index
    %c0_1 = arith.constant 0 : index
    %3 = vector.load %arg1[%c0, %c0_1] : memref<8x256xf32, #tpu.memory_space<vmem>>, vector<8x256xf32>
    %c0_2 = arith.constant 0 : index
    %c0_3 = arith.constant 0 : index
    %4 = vector.load %arg2[%c0_2, %c0_3] : memref<8x256xf32, #tpu.memory_space<vmem>>, vector<8x256xf32>
    %c0_4 = arith.constant 0 : index
    %c0_5 = arith.constant 0 : index
    %5 = vector.load %arg4[%c0_4, %c0_5] : memref<8x8xf32, #tpu.memory_space<vmem>>, vector<8x8xf32>
    %cst = arith.constant dense<0.000000e+00> : vector<8x8xf32>
    %6 = tpu.matmul %3, %3, %cst {dimension_numbers = #tpu.dot_dimension_numbers<[1], [1], [0], [0], [0, 0, 1, 0], [], []>, precision = #tpu.contract_precision<fp32>} : vector<8x256xf32>, vector<8x256xf32>, vector<8x8xf32> -> vector<8x8xf32>
    %7 = arith.addf %5, %6 : vector<8x8xf32>
    %c0_6 = arith.constant 0 : index
    %c0_7 = arith.constant 0 : index
    %8 = vector.load %arg4[%c0_6, %c0_7] : memref<8x8xf32, #tpu.memory_space<vmem>>, vector<8x8xf32>
    tpu.vector_store %arg4[%c0_6, %c0_7], %7 {strides = array<i32>} : memref<8x8xf32, #tpu.memory_space<vmem>>, vector<8x8xf32>,
    %c0_8 = arith.constant 0 : index
    %c0_9 = arith.constant 0 : index
    %9 = vector.load %arg5[%c0_8, %c0_9] : memref<8x8xf32, #tpu.memory_space<vmem>>, vector<8x8xf32>
    %cst_10 = arith.constant dense<0.000000e+00> : vector<8x8xf32>
    %10 = tpu.matmul %4, %4, %cst_10 {dimension_numbers = #tpu.dot_dimension_numbers<[1], [1], [0], [0], [0, 0, 1, 0], [], []>, precision = #tpu.contract_precision<fp32>} : vector<8x256xf32>, vector<8x256xf32>, vector<8x8xf32> -> vector<8x8xf32>
    %11 = arith.addf %9, %10 : vector<8x8xf32>
    %c0_11 = arith.constant 0 : index
    %c0_12 = arith.constant 0 : index
    %12 = vector.load %arg5[%c0_11, %c0_12] : memref<8x8xf32, #tpu.memory_space<vmem>>, vector<8x8xf32>
    tpu.vector_store %arg5[%c0_11, %c0_12], %11 {strides = array<i32>} : memref<8x8xf32, #tpu.memory_space<vmem>>, vector<8x8xf32>,
    %c0_i32_13 = arith.constant 0 : i32
    %13 = arith.cmpi eq, %arg0, %c0_i32_13 : i32
    %14 = arith.extui %13 : i1 to i32
    %c0_i32_14 = arith.constant 0 : i32
    %15 = arith.cmpi ne, %14, %c0_i32_14 : i32
    scf.if %15 {
      %c0_15 = arith.constant 0 : index
      %c0_16 = arith.constant 0 : index
      %16 = vector.load %arg4[%c0_15, %c0_16] : memref<8x8xf32, #tpu.memory_space<vmem>>, vector<8x8xf32>
      %c0_17 = arith.constant 0 : index
      %c0_18 = arith.constant 0 : index
      %17 = vector.load %arg5[%c0_17, %c0_18] : memref<8x8xf32, #tpu.memory_space<vmem>>, vector<8x8xf32>
      %18 = tpu.iota {dimensions = array<i32: 0>} : vector<8x8xi32>
      %19 = tpu.iota {dimensions = array<i32: 1>} : vector<8x8xi32>
      %20 = arith.cmpi eq, %18, %19 : vector<8x8xi32>
      %cst_19 = arith.constant 0.000000e+00 : f32
      %21 = vector.broadcast %cst_19 : f32 to vector<8x8xf32>
      %22 = arith.select %20, %16, %21 : vector<8x8xi1>, vector<8x8xf32>
      %cst_20 = arith.constant dense<0.000000e+00> : vector<8xf32>
      %23 = vector.multi_reduction <add>, %22, %cst_20 [1] : vector<8x8xf32> to vector<8xf32>
      %24 = vector.shape_cast %23 : vector<8xf32> to vector<8x1xf32>
      %cst_21 = arith.constant 0.000000e+00 : f32
      %25 = vector.broadcast %cst_21 : f32 to vector<8x8xf32>
      %26 = arith.select %20, %16, %25 : vector<8x8xi1>, vector<8x8xf32>
      %cst_22 = arith.constant dense<0.000000e+00> : vector<8xf32>
      %27 = vector.multi_reduction <add>, %26, %cst_22 [0] : vector<8x8xf32> to vector<8xf32>
      %28 = vector.shape_cast %27 : vector<8xf32> to vector<1x8xf32>
      %29 = vector.broadcast %24 : vector<8x1xf32> to vector<8x8xf32>
      %30 = vector.broadcast %28 : vector<1x8xf32> to vector<8x8xf32>
      %31 = arith.addf %29, %30 : vector<8x8xf32>
      %cst_23 = arith.constant 2.000000e+00 : f32
      %32 = vector.broadcast %cst_23 : f32 to vector<8x8xf32>
      %33 = arith.mulf %32, %16 : vector<8x8xf32>
      %34 = arith.subf %31, %33 : vector<8x8xf32>
      %cst_24 = arith.constant 9.99999996E-13 : f32
      %35 = vector.broadcast %cst_24 : f32 to vector<8x8xf32>
      %36 = arith.maximumf %34, %35 : vector<8x8xf32>
      %37 = math.sqrt %36 : vector<8x8xf32>
      %cst_25 = arith.constant 0.000000e+00 : f32
      %38 = vector.broadcast %cst_25 : f32 to vector<8x8xf32>
      %39 = arith.select %20, %38, %37 : vector<8x8xi1>, vector<8x8xf32>
      %cst_26 = arith.constant 0.000000e+00 : f32
      %40 = vector.broadcast %cst_26 : f32 to vector<8x8xf32>
      %41 = arith.cmpf ogt, %39, %40 : vector<8x8xf32>
      %42 = arith.extui %41 : vector<8x8xi1> to vector<8x8xi32>
      %43 = arith.sitofp %42 : vector<8x8xi32> to vector<8x8xf32>
      %44 = arith.mulf %39, %43 : vector<8x8xf32>
      %45 = vector.shape_cast %44 : vector<8x8xf32> to vector<1x8x8xf32>
      %cst_27 = arith.constant dense<0.000000e+00> : vector<1xf32>
      %46 = vector.multi_reduction <add>, %45, %cst_27 [1, 2] : vector<1x8x8xf32> to vector<1xf32>
      %47 = vector.shape_cast %46 : vector<1xf32> to vector<1x1x1xf32>
      %48 = vector.extract %47[0, 0, 0] : f32 from vector<1x1x1xf32>
      %49 = vector.shape_cast %43 : vector<8x8xf32> to vector<1x8x8xf32>
      %cst_28 = arith.constant dense<0.000000e+00> : vector<1xf32>
      %50 = vector.multi_reduction <add>, %49, %cst_28 [1, 2] : vector<1x8x8xf32> to vector<1xf32>
      %51 = vector.shape_cast %50 : vector<1xf32> to vector<1x1x1xf32>
      %52 = vector.extract %51[0, 0, 0] : f32 from vector<1x1x1xf32>
      %53 = arith.divf %48, %52 : f32
      %54 = vector.broadcast %53 : f32 to vector<8x8xf32>
      %55 = arith.divf %39, %54 : vector<8x8xf32>
      %cst_29 = arith.constant 0.000000e+00 : f32
      %56 = vector.broadcast %cst_29 : f32 to vector<8x8xf32>
      %57 = arith.select %20, %17, %56 : vector<8x8xi1>, vector<8x8xf32>
      %cst_30 = arith.constant dense<0.000000e+00> : vector<8xf32>
      %58 = vector.multi_reduction <add>, %57, %cst_30 [1] : vector<8x8xf32> to vector<8xf32>
      %59 = vector.shape_cast %58 : vector<8xf32> to vector<8x1xf32>
      %cst_31 = arith.constant 0.000000e+00 : f32
      %60 = vector.broadcast %cst_31 : f32 to vector<8x8xf32>
      %61 = arith.select %20, %17, %60 : vector<8x8xi1>, vector<8x8xf32>
      %cst_32 = arith.constant dense<0.000000e+00> : vector<8xf32>
      %62 = vector.multi_reduction <add>, %61, %cst_32 [0] : vector<8x8xf32> to vector<8xf32>
      %63 = vector.shape_cast %62 : vector<8xf32> to vector<1x8xf32>
      %64 = vector.broadcast %59 : vector<8x1xf32> to vector<8x8xf32>
      %65 = vector.broadcast %63 : vector<1x8xf32> to vector<8x8xf32>
      %66 = arith.addf %64, %65 : vector<8x8xf32>
      %cst_33 = arith.constant 2.000000e+00 : f32
      %67 = vector.broadcast %cst_33 : f32 to vector<8x8xf32>
      %68 = arith.mulf %67, %17 : vector<8x8xf32>
      %69 = arith.subf %66, %68 : vector<8x8xf32>
      %cst_34 = arith.constant 9.99999996E-13 : f32
      %70 = vector.broadcast %cst_34 : f32 to vector<8x8xf32>
      %71 = arith.maximumf %69, %70 : vector<8x8xf32>
      %72 = math.sqrt %71 : vector<8x8xf32>
      %cst_35 = arith.constant 0.000000e+00 : f32
      %73 = vector.broadcast %cst_35 : f32 to vector<8x8xf32>
      %74 = arith.select %20, %73, %72 : vector<8x8xi1>, vector<8x8xf32>
      %cst_36 = arith.constant 0.000000e+00 : f32
      %75 = vector.broadcast %cst_36 : f32 to vector<8x8xf32>
      %76 = arith.cmpf ogt, %74, %75 : vector<8x8xf32>
      %77 = arith.extui %76 : vector<8x8xi1> to vector<8x8xi32>
      %78 = arith.sitofp %77 : vector<8x8xi32> to vector<8x8xf32>
      %79 = arith.mulf %74, %78 : vector<8x8xf32>
      %80 = vector.shape_cast %79 : vector<8x8xf32> to vector<1x8x8xf32>
      %cst_37 = arith.constant dense<0.000000e+00> : vector<1xf32>
      %81 = vector.multi_reduction <add>, %80, %cst_37 [1, 2] : vector<1x8x8xf32> to vector<1xf32>
      %82 = vector.shape_cast %81 : vector<1xf32> to vector<1x1x1xf32>
      %83 = vector.extract %82[0, 0, 0] : f32 from vector<1x1x1xf32>
      %84 = vector.shape_cast %78 : vector<8x8xf32> to vector<1x8x8xf32>
      %cst_38 = arith.constant dense<0.000000e+00> : vector<1xf32>
      %85 = vector.multi_reduction <add>, %84, %cst_38 [1, 2] : vector<1x8x8xf32> to vector<1xf32>
      %86 = vector.shape_cast %85 : vector<1xf32> to vector<1x1x1xf32>
      %87 = vector.extract %86[0, 0, 0] : f32 from vector<1x1x1xf32>
      %88 = arith.divf %83, %87 : f32
      %89 = vector.broadcast %88 : f32 to vector<8x8xf32>
      %90 = arith.divf %74, %89 : vector<8x8xf32>
      %91 = arith.subf %55, %90 : vector<8x8xf32>
      %92 = math.absf %91 : vector<8x8xf32>
      %cst_39 = arith.constant 1.000000e+00 : f32
      %93 = vector.broadcast %cst_39 : f32 to vector<8x8xf32>
      %94 = arith.cmpf olt, %92, %93 : vector<8x8xf32>
      %cst_40 = arith.constant 5.000000e-01 : f32
      %95 = vector.broadcast %cst_40 : f32 to vector<8x8xf32>
      %96 = arith.mulf %95, %91 : vector<8x8xf32>
      %97 = arith.mulf %96, %91 : vector<8x8xf32>
      %cst_41 = arith.constant 5.000000e-01 : f32
      %98 = vector.broadcast %cst_41 : f32 to vector<8x8xf32>
      %99 = arith.subf %92, %98 : vector<8x8xf32>
      %100 = arith.select %94, %97, %99 : vector<8x8xi1>, vector<8x8xf32>
      %101 = vector.shape_cast %100 : vector<8x8xf32> to vector<1x8x8xf32>
      %cst_42 = arith.constant dense<0.000000e+00> : vector<1xf32>
      %102 = vector.multi_reduction <add>, %101, %cst_42 [1, 2] : vector<1x8x8xf32> to vector<1xf32>
      %103 = vector.shape_cast %102 : vector<1xf32> to vector<1x1x1xf32>
      %104 = vector.extract %103[0, 0, 0] : f32 from vector<1x1x1xf32>
      %cst_43 = arith.constant 6.400000e+01 : f32
      %105 = arith.divf %104, %cst_43 : f32
      %106 = vector.extract_strided_slice %24 {offsets = [0, 0], sizes = [1, 1], strides = [1, 1]} : vector<8x1xf32> to vector<1x1xf32>
      %107 = vector.extract_strided_slice %16 {offsets = [0, 0], sizes = [8, 1], strides = [1, 1]} : vector<8x8xf32> to vector<8x1xf32>
      %108 = vector.extract_strided_slice %16 {offsets = [0, 0], sizes = [1, 8], strides = [1, 1]} : vector<8x8xf32> to vector<1x8xf32>
      %109 = vector.broadcast %106 : vector<1x1xf32> to vector<8x1xf32>
      %110 = arith.addf %24, %109 : vector<8x1xf32>
      %cst_44 = arith.constant 2.000000e+00 : f32
      %111 = vector.broadcast %cst_44 : f32 to vector<8x1xf32>
      %112 = arith.mulf %111, %107 : vector<8x1xf32>
      %113 = arith.subf %110, %112 : vector<8x1xf32>
      %cst_45 = arith.constant 0.000000e+00 : f32
      %114 = vector.broadcast %cst_45 : f32 to vector<8x1xf32>
      %115 = arith.maximumf %113, %114 : vector<8x1xf32>
      %116 = vector.broadcast %106 : vector<1x1xf32> to vector<1x8xf32>
      %117 = arith.addf %28, %116 : vector<1x8xf32>
      %cst_46 = arith.constant 2.000000e+00 : f32
      %118 = vector.broadcast %cst_46 : f32 to vector<1x8xf32>
      %119 = arith.mulf %118, %108 : vector<1x8xf32>
      %120 = arith.subf %117, %119 : vector<1x8xf32>
      %cst_47 = arith.constant 0.000000e+00 : f32
      %121 = vector.broadcast %cst_47 : f32 to vector<1x8xf32>
      %122 = arith.maximumf %120, %121 : vector<1x8xf32>
      %123 = math.sqrt %115 : vector<8x1xf32>
      %cst_48 = arith.constant 9.99999996E-13 : f32
      %124 = vector.broadcast %cst_48 : f32 to vector<8x1xf32>
      %125 = arith.maximumf %123, %124 : vector<8x1xf32>
      %cst_49 = arith.constant 1.000000e+00 : f32
      %126 = vector.broadcast %cst_49 : f32 to vector<8x1xf32>
      %127 = arith.divf %126, %125 : vector<8x1xf32>
      %128 = math.sqrt %122 : vector<1x8xf32>
      %cst_50 = arith.constant 9.99999996E-13 : f32
      %129 = vector.broadcast %cst_50 : f32 to vector<1x8xf32>
      %130 = arith.maximumf %128, %129 : vector<1x8xf32>
      %cst_51 = arith.constant 1.000000e+00 : f32
      %131 = vector.broadcast %cst_51 : f32 to vector<1x8xf32>
      %132 = arith.divf %131, %130 : vector<1x8xf32>
      %133 = vector.broadcast %107 : vector<8x1xf32> to vector<8x8xf32>
      %134 = arith.subf %16, %133 : vector<8x8xf32>
      %135 = vector.broadcast %108 : vector<1x8xf32> to vector<8x8xf32>
      %136 = arith.subf %134, %135 : vector<8x8xf32>
      %137 = vector.broadcast %106 : vector<1x1xf32> to vector<8x8xf32>
      %138 = arith.addf %136, %137 : vector<8x8xf32>
      %139 = vector.broadcast %127 : vector<8x1xf32> to vector<8x8xf32>
      %140 = arith.mulf %138, %139 : vector<8x8xf32>
      %141 = vector.broadcast %132 : vector<1x8xf32> to vector<8x8xf32>
      %142 = arith.mulf %140, %141 : vector<8x8xf32>
      %c0_i32_52 = arith.constant 0 : i32
      %143 = vector.broadcast %c0_i32_52 : i32 to vector<8x8xi32>
      %144 = arith.cmpi ne, %18, %143 : vector<8x8xi32>
      %c0_i32_53 = arith.constant 0 : i32
      %145 = vector.broadcast %c0_i32_53 : i32 to vector<8x8xi32>
      %146 = arith.cmpi ne, %19, %145 : vector<8x8xi32>
      %147 = arith.andi %144, %146 : vector<8x8xi1>
      %cst_54 = arith.constant 0.000000e+00 : f32
      %148 = vector.broadcast %cst_54 : f32 to vector<8x8xf32>
      %149 = arith.select %147, %142, %148 : vector<8x8xi1>, vector<8x8xf32>
      %150 = vector.extract_strided_slice %59 {offsets = [0, 0], sizes = [1, 1], strides = [1, 1]} : vector<8x1xf32> to vector<1x1xf32>
      %151 = vector.extract_strided_slice %17 {offsets = [0, 0], sizes = [8, 1], strides = [1, 1]} : vector<8x8xf32> to vector<8x1xf32>
      %152 = vector.extract_strided_slice %17 {offsets = [0, 0], sizes = [1, 8], strides = [1, 1]} : vector<8x8xf32> to vector<1x8xf32>
      %153 = vector.broadcast %150 : vector<1x1xf32> to vector<8x1xf32>
      %154 = arith.addf %59, %153 : vector<8x1xf32>
      %cst_55 = arith.constant 2.000000e+00 : f32
      %155 = vector.broadcast %cst_55 : f32 to vector<8x1xf32>
      %156 = arith.mulf %155, %151 : vector<8x1xf32>
      %157 = arith.subf %154, %156 : vector<8x1xf32>
      %cst_56 = arith.constant 0.000000e+00 : f32
      %158 = vector.broadcast %cst_56 : f32 to vector<8x1xf32>
      %159 = arith.maximumf %157, %158 : vector<8x1xf32>
      %160 = vector.broadcast %150 : vector<1x1xf32> to vector<1x8xf32>
      %161 = arith.addf %63, %160 : vector<1x8xf32>
      %cst_57 = arith.constant 2.000000e+00 : f32
      %162 = vector.broadcast %cst_57 : f32 to vector<1x8xf32>
      %163 = arith.mulf %162, %152 : vector<1x8xf32>
      %164 = arith.subf %161, %163 : vector<1x8xf32>
      %cst_58 = arith.constant 0.000000e+00 : f32
      %165 = vector.broadcast %cst_58 : f32 to vector<1x8xf32>
      %166 = arith.maximumf %164, %165 : vector<1x8xf32>
      %167 = math.sqrt %159 : vector<8x1xf32>
      %cst_59 = arith.constant 9.99999996E-13 : f32
      %168 = vector.broadcast %cst_59 : f32 to vector<8x1xf32>
      %169 = arith.maximumf %167, %168 : vector<8x1xf32>
      %cst_60 = arith.constant 1.000000e+00 : f32
      %170 = vector.broadcast %cst_60 : f32 to vector<8x1xf32>
      %171 = arith.divf %170, %169 : vector<8x1xf32>
      %172 = math.sqrt %166 : vector<1x8xf32>
      %cst_61 = arith.constant 9.99999996E-13 : f32
      %173 = vector.broadcast %cst_61 : f32 to vector<1x8xf32>
      %174 = arith.maximumf %172, %173 : vector<1x8xf32>
      %cst_62 = arith.constant 1.000000e+00 : f32
      %175 = vector.broadcast %cst_62 : f32 to vector<1x8xf32>
      %176 = arith.divf %175, %174 : vector<1x8xf32>
      %177 = vector.broadcast %151 : vector<8x1xf32> to vector<8x8xf32>
      %178 = arith.subf %17, %177 : vector<8x8xf32>
      %179 = vector.broadcast %152 : vector<1x8xf32> to vector<8x8xf32>
      %180 = arith.subf %178, %179 : vector<8x8xf32>
      %181 = vector.broadcast %150 : vector<1x1xf32> to vector<8x8xf32>
      %182 = arith.addf %180, %181 : vector<8x8xf32>
      %183 = vector.broadcast %171 : vector<8x1xf32> to vector<8x8xf32>
      %184 = arith.mulf %182, %183 : vector<8x8xf32>
      %185 = vector.broadcast %176 : vector<1x8xf32> to vector<8x8xf32>
      %186 = arith.mulf %184, %185 : vector<8x8xf32>
      %c0_i32_63 = arith.constant 0 : i32
      %187 = vector.broadcast %c0_i32_63 : i32 to vector<8x8xi32>
      %188 = arith.cmpi ne, %18, %187 : vector<8x8xi32>
      %c0_i32_64 = arith.constant 0 : i32
      %189 = vector.broadcast %c0_i32_64 : i32 to vector<8x8xi32>
      %190 = arith.cmpi ne, %19, %189 : vector<8x8xi32>
      %191 = arith.andi %188, %190 : vector<8x8xi1>
      %cst_65 = arith.constant 0.000000e+00 : f32
      %192 = vector.broadcast %cst_65 : f32 to vector<8x8xf32>
      %193 = arith.select %191, %186, %192 : vector<8x8xi1>, vector<8x8xf32>
      %194 = arith.subf %149, %193 : vector<8x8xf32>
      %195 = math.absf %194 : vector<8x8xf32>
      %cst_66 = arith.constant 1.000000e+00 : f32
      %196 = vector.broadcast %cst_66 : f32 to vector<8x8xf32>
      %197 = arith.cmpf olt, %195, %196 : vector<8x8xf32>
      %cst_67 = arith.constant 5.000000e-01 : f32
      %198 = vector.broadcast %cst_67 : f32 to vector<8x8xf32>
      %199 = arith.mulf %198, %194 : vector<8x8xf32>
      %200 = arith.mulf %199, %194 : vector<8x8xf32>
      %cst_68 = arith.constant 5.000000e-01 : f32
      %201 = vector.broadcast %cst_68 : f32 to vector<8x8xf32>
      %202 = arith.subf %195, %201 : vector<8x8xf32>
      %203 = arith.select %197, %200, %202 : vector<8x8xi1>, vector<8x8xf32>
      %204 = vector.shape_cast %203 : vector<8x8xf32> to vector<1x8x8xf32>
      %cst_69 = arith.constant dense<0.000000e+00> : vector<1xf32>
      %205 = vector.multi_reduction <add>, %204, %cst_69 [1, 2] : vector<1x8x8xf32> to vector<1xf32>
      %206 = vector.shape_cast %205 : vector<1xf32> to vector<1x1x1xf32>
      %207 = vector.extract %206[0, 0, 0] : f32 from vector<1x1x1xf32>
      %cst_70 = arith.constant 0.000000e+00 : f32
      %208 = arith.addf %cst_70, %207 : f32
      %209 = vector.extract_strided_slice %24 {offsets = [1, 0], sizes = [1, 1], strides = [1, 1]} : vector<8x1xf32> to vector<1x1xf32>
      %210 = vector.extract_strided_slice %16 {offsets = [0, 1], sizes = [8, 1], strides = [1, 1]} : vector<8x8xf32> to vector<8x1xf32>
      %211 = vector.extract_strided_slice %16 {offsets = [1, 0], sizes = [1, 8], strides = [1, 1]} : vector<8x8xf32> to vector<1x8xf32>
      %212 = vector.broadcast %209 : vector<1x1xf32> to vector<8x1xf32>
      %213 = arith.addf %24, %212 : vector<8x1xf32>
      %cst_71 = arith.constant 2.000000e+00 : f32
      %214 = vector.broadcast %cst_71 : f32 to vector<8x1xf32>
      %215 = arith.mulf %214, %210 : vector<8x1xf32>
      %216 = arith.subf %213, %215 : vector<8x1xf32>
      %cst_72 = arith.constant 0.000000e+00 : f32
      %217 = vector.broadcast %cst_72 : f32 to vector<8x1xf32>
      %218 = arith.maximumf %216, %217 : vector<8x1xf32>
      %219 = vector.broadcast %209 : vector<1x1xf32> to vector<1x8xf32>
      %220 = arith.addf %28, %219 : vector<1x8xf32>
      %cst_73 = arith.constant 2.000000e+00 : f32
      %221 = vector.broadcast %cst_73 : f32 to vector<1x8xf32>
      %222 = arith.mulf %221, %211 : vector<1x8xf32>
      %223 = arith.subf %220, %222 : vector<1x8xf32>
      %cst_74 = arith.constant 0.000000e+00 : f32
      %224 = vector.broadcast %cst_74 : f32 to vector<1x8xf32>
      %225 = arith.maximumf %223, %224 : vector<1x8xf32>
      %226 = math.sqrt %218 : vector<8x1xf32>
      %cst_75 = arith.constant 9.99999996E-13 : f32
      %227 = vector.broadcast %cst_75 : f32 to vector<8x1xf32>
      %228 = arith.maximumf %226, %227 : vector<8x1xf32>
      %cst_76 = arith.constant 1.000000e+00 : f32
      %229 = vector.broadcast %cst_76 : f32 to vector<8x1xf32>
      %230 = arith.divf %229, %228 : vector<8x1xf32>
      %231 = math.sqrt %225 : vector<1x8xf32>
      %cst_77 = arith.constant 9.99999996E-13 : f32
      %232 = vector.broadcast %cst_77 : f32 to vector<1x8xf32>
      %233 = arith.maximumf %231, %232 : vector<1x8xf32>
      %cst_78 = arith.constant 1.000000e+00 : f32
      %234 = vector.broadcast %cst_78 : f32 to vector<1x8xf32>
      %235 = arith.divf %234, %233 : vector<1x8xf32>
      %236 = vector.broadcast %210 : vector<8x1xf32> to vector<8x8xf32>
      %237 = arith.subf %16, %236 : vector<8x8xf32>
      %238 = vector.broadcast %211 : vector<1x8xf32> to vector<8x8xf32>
      %239 = arith.subf %237, %238 : vector<8x8xf32>
      %240 = vector.broadcast %209 : vector<1x1xf32> to vector<8x8xf32>
      %241 = arith.addf %239, %240 : vector<8x8xf32>
      %242 = vector.broadcast %230 : vector<8x1xf32> to vector<8x8xf32>
      %243 = arith.mulf %241, %242 : vector<8x8xf32>
      %244 = vector.broadcast %235 : vector<1x8xf32> to vector<8x8xf32>
      %245 = arith.mulf %243, %244 : vector<8x8xf32>
      %c1_i32 = arith.constant 1 : i32
      %246 = vector.broadcast %c1_i32 : i32 to vector<8x8xi32>
      %247 = arith.cmpi ne, %18, %246 : vector<8x8xi32>
      %c1_i32_79 = arith.constant 1 : i32
      %248 = vector.broadcast %c1_i32_79 : i32 to vector<8x8xi32>
      %249 = arith.cmpi ne, %19, %248 : vector<8x8xi32>
      %250 = arith.andi %247, %249 : vector<8x8xi1>
      %cst_80 = arith.constant 0.000000e+00 : f32
      %251 = vector.broadcast %cst_80 : f32 to vector<8x8xf32>
      %252 = arith.select %250, %245, %251 : vector<8x8xi1>, vector<8x8xf32>
      %253 = vector.extract_strided_slice %59 {offsets = [1, 0], sizes = [1, 1], strides = [1, 1]} : vector<8x1xf32> to vector<1x1xf32>
      %254 = vector.extract_strided_slice %17 {offsets = [0, 1], sizes = [8, 1], strides = [1, 1]} : vector<8x8xf32> to vector<8x1xf32>
      %255 = vector.extract_strided_slice %17 {offsets = [1, 0], sizes = [1, 8], strides = [1, 1]} : vector<8x8xf32> to vector<1x8xf32>
      %256 = vector.broadcast %253 : vector<1x1xf32> to vector<8x1xf32>
      %257 = arith.addf %59, %256 : vector<8x1xf32>
      %cst_81 = arith.constant 2.000000e+00 : f32
      %258 = vector.broadcast %cst_81 : f32 to vector<8x1xf32>
      %259 = arith.mulf %258, %254 : vector<8x1xf32>
      %260 = arith.subf %257, %259 : vector<8x1xf32>
      %cst_82 = arith.constant 0.000000e+00 : f32
      %261 = vector.broadcast %cst_82 : f32 to vector<8x1xf32>
      %262 = arith.maximumf %260, %261 : vector<8x1xf32>
      %263 = vector.broadcast %253 : vector<1x1xf32> to vector<1x8xf32>
      %264 = arith.addf %63, %263 : vector<1x8xf32>
      %cst_83 = arith.constant 2.000000e+00 : f32
      %265 = vector.broadcast %cst_83 : f32 to vector<1x8xf32>
      %266 = arith.mulf %265, %255 : vector<1x8xf32>
      %267 = arith.subf %264, %266 : vector<1x8xf32>
      %cst_84 = arith.constant 0.000000e+00 : f32
      %268 = vector.broadcast %cst_84 : f32 to vector<1x8xf32>
      %269 = arith.maximumf %267, %268 : vector<1x8xf32>
      %270 = math.sqrt %262 : vector<8x1xf32>
      %cst_85 = arith.constant 9.99999996E-13 : f32
      %271 = vector.broadcast %cst_85 : f32 to vector<8x1xf32>
      %272 = arith.maximumf %270, %271 : vector<8x1xf32>
      %cst_86 = arith.constant 1.000000e+00 : f32
      %273 = vector.broadcast %cst_86 : f32 to vector<8x1xf32>
      %274 = arith.divf %273, %272 : vector<8x1xf32>
      %275 = math.sqrt %269 : vector<1x8xf32>
      %cst_87 = arith.constant 9.99999996E-13 : f32
      %276 = vector.broadcast %cst_87 : f32 to vector<1x8xf32>
      %277 = arith.maximumf %275, %276 : vector<1x8xf32>
      %cst_88 = arith.constant 1.000000e+00 : f32
      %278 = vector.broadcast %cst_88 : f32 to vector<1x8xf32>
      %279 = arith.divf %278, %277 : vector<1x8xf32>
      %280 = vector.broadcast %254 : vector<8x1xf32> to vector<8x8xf32>
      %281 = arith.subf %17, %280 : vector<8x8xf32>
      %282 = vector.broadcast %255 : vector<1x8xf32> to vector<8x8xf32>
      %283 = arith.subf %281, %282 : vector<8x8xf32>
      %284 = vector.broadcast %253 : vector<1x1xf32> to vector<8x8xf32>
      %285 = arith.addf %283, %284 : vector<8x8xf32>
      %286 = vector.broadcast %274 : vector<8x1xf32> to vector<8x8xf32>
      %287 = arith.mulf %285, %286 : vector<8x8xf32>
      %288 = vector.broadcast %279 : vector<1x8xf32> to vector<8x8xf32>
      %289 = arith.mulf %287, %288 : vector<8x8xf32>
      %c1_i32_89 = arith.constant 1 : i32
      %290 = vector.broadcast %c1_i32_89 : i32 to vector<8x8xi32>
      %291 = arith.cmpi ne, %18, %290 : vector<8x8xi32>
      %c1_i32_90 = arith.constant 1 : i32
      %292 = vector.broadcast %c1_i32_90 : i32 to vector<8x8xi32>
      %293 = arith.cmpi ne, %19, %292 : vector<8x8xi32>
      %294 = arith.andi %291, %293 : vector<8x8xi1>
      %cst_91 = arith.constant 0.000000e+00 : f32
      %295 = vector.broadcast %cst_91 : f32 to vector<8x8xf32>
      %296 = arith.select %294, %289, %295 : vector<8x8xi1>, vector<8x8xf32>
      %297 = arith.subf %252, %296 : vector<8x8xf32>
      %298 = math.absf %297 : vector<8x8xf32>
      %cst_92 = arith.constant 1.000000e+00 : f32
      %299 = vector.broadcast %cst_92 : f32 to vector<8x8xf32>
      %300 = arith.cmpf olt, %298, %299 : vector<8x8xf32>
      %cst_93 = arith.constant 5.000000e-01 : f32
      %301 = vector.broadcast %cst_93 : f32 to vector<8x8xf32>
      %302 = arith.mulf %301, %297 : vector<8x8xf32>
      %303 = arith.mulf %302, %297 : vector<8x8xf32>
      %cst_94 = arith.constant 5.000000e-01 : f32
      %304 = vector.broadcast %cst_94 : f32 to vector<8x8xf32>
      %305 = arith.subf %298, %304 : vector<8x8xf32>
      %306 = arith.select %300, %303, %305 : vector<8x8xi1>, vector<8x8xf32>
      %307 = vector.shape_cast %306 : vector<8x8xf32> to vector<1x8x8xf32>
      %cst_95 = arith.constant dense<0.000000e+00> : vector<1xf32>
      %308 = vector.multi_reduction <add>, %307, %cst_95 [1, 2] : vector<1x8x8xf32> to vector<1xf32>
      %309 = vector.shape_cast %308 : vector<1xf32> to vector<1x1x1xf32>
      %310 = vector.extract %309[0, 0, 0] : f32 from vector<1x1x1xf32>
      %311 = arith.addf %208, %310 : f32
      %312 = vector.extract_strided_slice %24 {offsets = [2, 0], sizes = [1, 1], strides = [1, 1]} : vector<8x1xf32> to vector<1x1xf32>
      %313 = vector.extract_strided_slice %16 {offsets = [0, 2], sizes = [8, 1], strides = [1, 1]} : vector<8x8xf32> to vector<8x1xf32>
      %314 = vector.extract_strided_slice %16 {offsets = [2, 0], sizes = [1, 8], strides = [1, 1]} : vector<8x8xf32> to vector<1x8xf32>
      %315 = vector.broadcast %312 : vector<1x1xf32> to vector<8x1xf32>
      %316 = arith.addf %24, %315 : vector<8x1xf32>
      %cst_96 = arith.constant 2.000000e+00 : f32
      %317 = vector.broadcast %cst_96 : f32 to vector<8x1xf32>
      %318 = arith.mulf %317, %313 : vector<8x1xf32>
      %319 = arith.subf %316, %318 : vector<8x1xf32>
      %cst_97 = arith.constant 0.000000e+00 : f32
      %320 = vector.broadcast %cst_97 : f32 to vector<8x1xf32>
      %321 = arith.maximumf %319, %320 : vector<8x1xf32>
      %322 = vector.broadcast %312 : vector<1x1xf32> to vector<1x8xf32>
      %323 = arith.addf %28, %322 : vector<1x8xf32>
      %cst_98 = arith.constant 2.000000e+00 : f32
      %324 = vector.broadcast %cst_98 : f32 to vector<1x8xf32>
      %325 = arith.mulf %324, %314 : vector<1x8xf32>
      %326 = arith.subf %323, %325 : vector<1x8xf32>
      %cst_99 = arith.constant 0.000000e+00 : f32
      %327 = vector.broadcast %cst_99 : f32 to vector<1x8xf32>
      %328 = arith.maximumf %326, %327 : vector<1x8xf32>
      %329 = math.sqrt %321 : vector<8x1xf32>
      %cst_100 = arith.constant 9.99999996E-13 : f32
      %330 = vector.broadcast %cst_100 : f32 to vector<8x1xf32>
      %331 = arith.maximumf %329, %330 : vector<8x1xf32>
      %cst_101 = arith.constant 1.000000e+00 : f32
      %332 = vector.broadcast %cst_101 : f32 to vector<8x1xf32>
      %333 = arith.divf %332, %331 : vector<8x1xf32>
      %334 = math.sqrt %328 : vector<1x8xf32>
      %cst_102 = arith.constant 9.99999996E-13 : f32
      %335 = vector.broadcast %cst_102 : f32 to vector<1x8xf32>
      %336 = arith.maximumf %334, %335 : vector<1x8xf32>
      %cst_103 = arith.constant 1.000000e+00 : f32
      %337 = vector.broadcast %cst_103 : f32 to vector<1x8xf32>
      %338 = arith.divf %337, %336 : vector<1x8xf32>
      %339 = vector.broadcast %313 : vector<8x1xf32> to vector<8x8xf32>
      %340 = arith.subf %16, %339 : vector<8x8xf32>
      %341 = vector.broadcast %314 : vector<1x8xf32> to vector<8x8xf32>
      %342 = arith.subf %340, %341 : vector<8x8xf32>
      %343 = vector.broadcast %312 : vector<1x1xf32> to vector<8x8xf32>
      %344 = arith.addf %342, %343 : vector<8x8xf32>
      %345 = vector.broadcast %333 : vector<8x1xf32> to vector<8x8xf32>
      %346 = arith.mulf %344, %345 : vector<8x8xf32>
      %347 = vector.broadcast %338 : vector<1x8xf32> to vector<8x8xf32>
      %348 = arith.mulf %346, %347 : vector<8x8xf32>
      %c2_i32 = arith.constant 2 : i32
      %349 = vector.broadcast %c2_i32 : i32 to vector<8x8xi32>
      %350 = arith.cmpi ne, %18, %349 : vector<8x8xi32>
      %c2_i32_104 = arith.constant 2 : i32
      %351 = vector.broadcast %c2_i32_104 : i32 to vector<8x8xi32>
      %352 = arith.cmpi ne, %19, %351 : vector<8x8xi32>
      %353 = arith.andi %350, %352 : vector<8x8xi1>
      %cst_105 = arith.constant 0.000000e+00 : f32
      %354 = vector.broadcast %cst_105 : f32 to vector<8x8xf32>
      %355 = arith.select %353, %348, %354 : vector<8x8xi1>, vector<8x8xf32>
      %356 = vector.extract_strided_slice %59 {offsets = [2, 0], sizes = [1, 1], strides = [1, 1]} : vector<8x1xf32> to vector<1x1xf32>
      %357 = vector.extract_strided_slice %17 {offsets = [0, 2], sizes = [8, 1], strides = [1, 1]} : vector<8x8xf32> to vector<8x1xf32>
      %358 = vector.extract_strided_slice %17 {offsets = [2, 0], sizes = [1, 8], strides = [1, 1]} : vector<8x8xf32> to vector<1x8xf32>
      %359 = vector.broadcast %356 : vector<1x1xf32> to vector<8x1xf32>
      %360 = arith.addf %59, %359 : vector<8x1xf32>
      %cst_106 = arith.constant 2.000000e+00 : f32
      %361 = vector.broadcast %cst_106 : f32 to vector<8x1xf32>
      %362 = arith.mulf %361, %357 : vector<8x1xf32>
      %363 = arith.subf %360, %362 : vector<8x1xf32>
      %cst_107 = arith.constant 0.000000e+00 : f32
      %364 = vector.broadcast %cst_107 : f32 to vector<8x1xf32>
      %365 = arith.maximumf %363, %364 : vector<8x1xf32>
      %366 = vector.broadcast %356 : vector<1x1xf32> to vector<1x8xf32>
      %367 = arith.addf %63, %366 : vector<1x8xf32>
      %cst_108 = arith.constant 2.000000e+00 : f32
      %368 = vector.broadcast %cst_108 : f32 to vector<1x8xf32>
      %369 = arith.mulf %368, %358 : vector<1x8xf32>
      %370 = arith.subf %367, %369 : vector<1x8xf32>
      %cst_109 = arith.constant 0.000000e+00 : f32
      %371 = vector.broadcast %cst_109 : f32 to vector<1x8xf32>
      %372 = arith.maximumf %370, %371 : vector<1x8xf32>
      %373 = math.sqrt %365 : vector<8x1xf32>
      %cst_110 = arith.constant 9.99999996E-13 : f32
      %374 = vector.broadcast %cst_110 : f32 to vector<8x1xf32>
      %375 = arith.maximumf %373, %374 : vector<8x1xf32>
      %cst_111 = arith.constant 1.000000e+00 : f32
      %376 = vector.broadcast %cst_111 : f32 to vector<8x1xf32>
      %377 = arith.divf %376, %375 : vector<8x1xf32>
      %378 = math.sqrt %372 : vector<1x8xf32>
      %cst_112 = arith.constant 9.99999996E-13 : f32
      %379 = vector.broadcast %cst_112 : f32 to vector<1x8xf32>
      %380 = arith.maximumf %378, %379 : vector<1x8xf32>
      %cst_113 = arith.constant 1.000000e+00 : f32
      %381 = vector.broadcast %cst_113 : f32 to vector<1x8xf32>
      %382 = arith.divf %381, %380 : vector<1x8xf32>
      %383 = vector.broadcast %357 : vector<8x1xf32> to vector<8x8xf32>
      %384 = arith.subf %17, %383 : vector<8x8xf32>
      %385 = vector.broadcast %358 : vector<1x8xf32> to vector<8x8xf32>
      %386 = arith.subf %384, %385 : vector<8x8xf32>
      %387 = vector.broadcast %356 : vector<1x1xf32> to vector<8x8xf32>
      %388 = arith.addf %386, %387 : vector<8x8xf32>
      %389 = vector.broadcast %377 : vector<8x1xf32> to vector<8x8xf32>
      %390 = arith.mulf %388, %389 : vector<8x8xf32>
      %391 = vector.broadcast %382 : vector<1x8xf32> to vector<8x8xf32>
      %392 = arith.mulf %390, %391 : vector<8x8xf32>
      %c2_i32_114 = arith.constant 2 : i32
      %393 = vector.broadcast %c2_i32_114 : i32 to vector<8x8xi32>
      %394 = arith.cmpi ne, %18, %393 : vector<8x8xi32>
      %c2_i32_115 = arith.constant 2 : i32
      %395 = vector.broadcast %c2_i32_115 : i32 to vector<8x8xi32>
      %396 = arith.cmpi ne, %19, %395 : vector<8x8xi32>
      %397 = arith.andi %394, %396 : vector<8x8xi1>
      %cst_116 = arith.constant 0.000000e+00 : f32
      %398 = vector.broadcast %cst_116 : f32 to vector<8x8xf32>
      %399 = arith.select %397, %392, %398 : vector<8x8xi1>, vector<8x8xf32>
      %400 = arith.subf %355, %399 : vector<8x8xf32>
      %401 = math.absf %400 : vector<8x8xf32>
      %cst_117 = arith.constant 1.000000e+00 : f32
      %402 = vector.broadcast %cst_117 : f32 to vector<8x8xf32>
      %403 = arith.cmpf olt, %401, %402 : vector<8x8xf32>
      %cst_118 = arith.constant 5.000000e-01 : f32
      %404 = vector.broadcast %cst_118 : f32 to vector<8x8xf32>
      %405 = arith.mulf %404, %400 : vector<8x8xf32>
      %406 = arith.mulf %405, %400 : vector<8x8xf32>
      %cst_119 = arith.constant 5.000000e-01 : f32
      %407 = vector.broadcast %cst_119 : f32 to vector<8x8xf32>
      %408 = arith.subf %401, %407 : vector<8x8xf32>
      %409 = arith.select %403, %406, %408 : vector<8x8xi1>, vector<8x8xf32>
      %410 = vector.shape_cast %409 : vector<8x8xf32> to vector<1x8x8xf32>
      %cst_120 = arith.constant dense<0.000000e+00> : vector<1xf32>
      %411 = vector.multi_reduction <add>, %410, %cst_120 [1, 2] : vector<1x8x8xf32> to vector<1xf32>
      %412 = vector.shape_cast %411 : vector<1xf32> to vector<1x1x1xf32>
      %413 = vector.extract %412[0, 0, 0] : f32 from vector<1x1x1xf32>
      %414 = arith.addf %311, %413 : f32
      %415 = vector.extract_strided_slice %24 {offsets = [3, 0], sizes = [1, 1], strides = [1, 1]} : vector<8x1xf32> to vector<1x1xf32>
      %416 = vector.extract_strided_slice %16 {offsets = [0, 3], sizes = [8, 1], strides = [1, 1]} : vector<8x8xf32> to vector<8x1xf32>
      %417 = vector.extract_strided_slice %16 {offsets = [3, 0], sizes = [1, 8], strides = [1, 1]} : vector<8x8xf32> to vector<1x8xf32>
      %418 = vector.broadcast %415 : vector<1x1xf32> to vector<8x1xf32>
      %419 = arith.addf %24, %418 : vector<8x1xf32>
      %cst_121 = arith.constant 2.000000e+00 : f32
      %420 = vector.broadcast %cst_121 : f32 to vector<8x1xf32>
      %421 = arith.mulf %420, %416 : vector<8x1xf32>
      %422 = arith.subf %419, %421 : vector<8x1xf32>
      %cst_122 = arith.constant 0.000000e+00 : f32
      %423 = vector.broadcast %cst_122 : f32 to vector<8x1xf32>
      %424 = arith.maximumf %422, %423 : vector<8x1xf32>
      %425 = vector.broadcast %415 : vector<1x1xf32> to vector<1x8xf32>
      %426 = arith.addf %28, %425 : vector<1x8xf32>
      %cst_123 = arith.constant 2.000000e+00 : f32
      %427 = vector.broadcast %cst_123 : f32 to vector<1x8xf32>
      %428 = arith.mulf %427, %417 : vector<1x8xf32>
      %429 = arith.subf %426, %428 : vector<1x8xf32>
      %cst_124 = arith.constant 0.000000e+00 : f32
      %430 = vector.broadcast %cst_124 : f32 to vector<1x8xf32>
      %431 = arith.maximumf %429, %430 : vector<1x8xf32>
      %432 = math.sqrt %424 : vector<8x1xf32>
      %cst_125 = arith.constant 9.99999996E-13 : f32
      %433 = vector.broadcast %cst_125 : f32 to vector<8x1xf32>
      %434 = arith.maximumf %432, %433 : vector<8x1xf32>
      %cst_126 = arith.constant 1.000000e+00 : f32
      %435 = vector.broadcast %cst_126 : f32 to vector<8x1xf32>
      %436 = arith.divf %435, %434 : vector<8x1xf32>
      %437 = math.sqrt %431 : vector<1x8xf32>
      %cst_127 = arith.constant 9.99999996E-13 : f32
      %438 = vector.broadcast %cst_127 : f32 to vector<1x8xf32>
      %439 = arith.maximumf %437, %438 : vector<1x8xf32>
      %cst_128 = arith.constant 1.000000e+00 : f32
      %440 = vector.broadcast %cst_128 : f32 to vector<1x8xf32>
      %441 = arith.divf %440, %439 : vector<1x8xf32>
      %442 = vector.broadcast %416 : vector<8x1xf32> to vector<8x8xf32>
      %443 = arith.subf %16, %442 : vector<8x8xf32>
      %444 = vector.broadcast %417 : vector<1x8xf32> to vector<8x8xf32>
      %445 = arith.subf %443, %444 : vector<8x8xf32>
      %446 = vector.broadcast %415 : vector<1x1xf32> to vector<8x8xf32>
      %447 = arith.addf %445, %446 : vector<8x8xf32>
      %448 = vector.broadcast %436 : vector<8x1xf32> to vector<8x8xf32>
      %449 = arith.mulf %447, %448 : vector<8x8xf32>
      %450 = vector.broadcast %441 : vector<1x8xf32> to vector<8x8xf32>
      %451 = arith.mulf %449, %450 : vector<8x8xf32>
      %c3_i32 = arith.constant 3 : i32
      %452 = vector.broadcast %c3_i32 : i32 to vector<8x8xi32>
      %453 = arith.cmpi ne, %18, %452 : vector<8x8xi32>
      %c3_i32_129 = arith.constant 3 : i32
      %454 = vector.broadcast %c3_i32_129 : i32 to vector<8x8xi32>
      %455 = arith.cmpi ne, %19, %454 : vector<8x8xi32>
      %456 = arith.andi %453, %455 : vector<8x8xi1>
      %cst_130 = arith.constant 0.000000e+00 : f32
      %457 = vector.broadcast %cst_130 : f32 to vector<8x8xf32>
      %458 = arith.select %456, %451, %457 : vector<8x8xi1>, vector<8x8xf32>
      %459 = vector.extract_strided_slice %59 {offsets = [3, 0], sizes = [1, 1], strides = [1, 1]} : vector<8x1xf32> to vector<1x1xf32>
      %460 = vector.extract_strided_slice %17 {offsets = [0, 3], sizes = [8, 1], strides = [1, 1]} : vector<8x8xf32> to vector<8x1xf32>
      %461 = vector.extract_strided_slice %17 {offsets = [3, 0], sizes = [1, 8], strides = [1, 1]} : vector<8x8xf32> to vector<1x8xf32>
      %462 = vector.broadcast %459 : vector<1x1xf32> to vector<8x1xf32>
      %463 = arith.addf %59, %462 : vector<8x1xf32>
      %cst_131 = arith.constant 2.000000e+00 : f32
      %464 = vector.broadcast %cst_131 : f32 to vector<8x1xf32>
      %465 = arith.mulf %464, %460 : vector<8x1xf32>
      %466 = arith.subf %463, %465 : vector<8x1xf32>
      %cst_132 = arith.constant 0.000000e+00 : f32
      %467 = vector.broadcast %cst_132 : f32 to vector<8x1xf32>
      %468 = arith.maximumf %466, %467 : vector<8x1xf32>
      %469 = vector.broadcast %459 : vector<1x1xf32> to vector<1x8xf32>
      %470 = arith.addf %63, %469 : vector<1x8xf32>
      %cst_133 = arith.constant 2.000000e+00 : f32
      %471 = vector.broadcast %cst_133 : f32 to vector<1x8xf32>
      %472 = arith.mulf %471, %461 : vector<1x8xf32>
      %473 = arith.subf %470, %472 : vector<1x8xf32>
      %cst_134 = arith.constant 0.000000e+00 : f32
      %474 = vector.broadcast %cst_134 : f32 to vector<1x8xf32>
      %475 = arith.maximumf %473, %474 : vector<1x8xf32>
      %476 = math.sqrt %468 : vector<8x1xf32>
      %cst_135 = arith.constant 9.99999996E-13 : f32
      %477 = vector.broadcast %cst_135 : f32 to vector<8x1xf32>
      %478 = arith.maximumf %476, %477 : vector<8x1xf32>
      %cst_136 = arith.constant 1.000000e+00 : f32
      %479 = vector.broadcast %cst_136 : f32 to vector<8x1xf32>
      %480 = arith.divf %479, %478 : vector<8x1xf32>
      %481 = math.sqrt %475 : vector<1x8xf32>
      %cst_137 = arith.constant 9.99999996E-13 : f32
      %482 = vector.broadcast %cst_137 : f32 to vector<1x8xf32>
      %483 = arith.maximumf %481, %482 : vector<1x8xf32>
      %cst_138 = arith.constant 1.000000e+00 : f32
      %484 = vector.broadcast %cst_138 : f32 to vector<1x8xf32>
      %485 = arith.divf %484, %483 : vector<1x8xf32>
      %486 = vector.broadcast %460 : vector<8x1xf32> to vector<8x8xf32>
      %487 = arith.subf %17, %486 : vector<8x8xf32>
      %488 = vector.broadcast %461 : vector<1x8xf32> to vector<8x8xf32>
      %489 = arith.subf %487, %488 : vector<8x8xf32>
      %490 = vector.broadcast %459 : vector<1x1xf32> to vector<8x8xf32>
      %491 = arith.addf %489, %490 : vector<8x8xf32>
      %492 = vector.broadcast %480 : vector<8x1xf32> to vector<8x8xf32>
      %493 = arith.mulf %491, %492 : vector<8x8xf32>
      %494 = vector.broadcast %485 : vector<1x8xf32> to vector<8x8xf32>
      %495 = arith.mulf %493, %494 : vector<8x8xf32>
      %c3_i32_139 = arith.constant 3 : i32
      %496 = vector.broadcast %c3_i32_139 : i32 to vector<8x8xi32>
      %497 = arith.cmpi ne, %18, %496 : vector<8x8xi32>
      %c3_i32_140 = arith.constant 3 : i32
      %498 = vector.broadcast %c3_i32_140 : i32 to vector<8x8xi32>
      %499 = arith.cmpi ne, %19, %498 : vector<8x8xi32>
      %500 = arith.andi %497, %499 : vector<8x8xi1>
      %cst_141 = arith.constant 0.000000e+00 : f32
      %501 = vector.broadcast %cst_141 : f32 to vector<8x8xf32>
      %502 = arith.select %500, %495, %501 : vector<8x8xi1>, vector<8x8xf32>
      %503 = arith.subf %458, %502 : vector<8x8xf32>
      %504 = math.absf %503 : vector<8x8xf32>
      %cst_142 = arith.constant 1.000000e+00 : f32
      %505 = vector.broadcast %cst_142 : f32 to vector<8x8xf32>
      %506 = arith.cmpf olt, %504, %505 : vector<8x8xf32>
      %cst_143 = arith.constant 5.000000e-01 : f32
      %507 = vector.broadcast %cst_143 : f32 to vector<8x8xf32>
      %508 = arith.mulf %507, %503 : vector<8x8xf32>
      %509 = arith.mulf %508, %503 : vector<8x8xf32>
      %cst_144 = arith.constant 5.000000e-01 : f32
      %510 = vector.broadcast %cst_144 : f32 to vector<8x8xf32>
      %511 = arith.subf %504, %510 : vector<8x8xf32>
      %512 = arith.select %506, %509, %511 : vector<8x8xi1>, vector<8x8xf32>
      %513 = vector.shape_cast %512 : vector<8x8xf32> to vector<1x8x8xf32>
      %cst_145 = arith.constant dense<0.000000e+00> : vector<1xf32>
      %514 = vector.multi_reduction <add>, %513, %cst_145 [1, 2] : vector<1x8x8xf32> to vector<1xf32>
      %515 = vector.shape_cast %514 : vector<1xf32> to vector<1x1x1xf32>
      %516 = vector.extract %515[0, 0, 0] : f32 from vector<1x1x1xf32>
      %517 = arith.addf %414, %516 : f32
      %518 = vector.extract_strided_slice %24 {offsets = [4, 0], sizes = [1, 1], strides = [1, 1]} : vector<8x1xf32> to vector<1x1xf32>
      %519 = vector.extract_strided_slice %16 {offsets = [0, 4], sizes = [8, 1], strides = [1, 1]} : vector<8x8xf32> to vector<8x1xf32>
      %520 = vector.extract_strided_slice %16 {offsets = [4, 0], sizes = [1, 8], strides = [1, 1]} : vector<8x8xf32> to vector<1x8xf32>
      %521 = vector.broadcast %518 : vector<1x1xf32> to vector<8x1xf32>
      %522 = arith.addf %24, %521 : vector<8x1xf32>
      %cst_146 = arith.constant 2.000000e+00 : f32
      %523 = vector.broadcast %cst_146 : f32 to vector<8x1xf32>
      %524 = arith.mulf %523, %519 : vector<8x1xf32>
      %525 = arith.subf %522, %524 : vector<8x1xf32>
      %cst_147 = arith.constant 0.000000e+00 : f32
      %526 = vector.broadcast %cst_147 : f32 to vector<8x1xf32>
      %527 = arith.maximumf %525, %526 : vector<8x1xf32>
      %528 = vector.broadcast %518 : vector<1x1xf32> to vector<1x8xf32>
      %529 = arith.addf %28, %528 : vector<1x8xf32>
      %cst_148 = arith.constant 2.000000e+00 : f32
      %530 = vector.broadcast %cst_148 : f32 to vector<1x8xf32>
      %531 = arith.mulf %530, %520 : vector<1x8xf32>
      %532 = arith.subf %529, %531 : vector<1x8xf32>
      %cst_149 = arith.constant 0.000000e+00 : f32
      %533 = vector.broadcast %cst_149 : f32 to vector<1x8xf32>
      %534 = arith.maximumf %532, %533 : vector<1x8xf32>
      %535 = math.sqrt %527 : vector<8x1xf32>
      %cst_150 = arith.constant 9.99999996E-13 : f32
      %536 = vector.broadcast %cst_150 : f32 to vector<8x1xf32>
      %537 = arith.maximumf %535, %536 : vector<8x1xf32>
      %cst_151 = arith.constant 1.000000e+00 : f32
      %538 = vector.broadcast %cst_151 : f32 to vector<8x1xf32>
      %539 = arith.divf %538, %537 : vector<8x1xf32>
      %540 = math.sqrt %534 : vector<1x8xf32>
      %cst_152 = arith.constant 9.99999996E-13 : f32
      %541 = vector.broadcast %cst_152 : f32 to vector<1x8xf32>
      %542 = arith.maximumf %540, %541 : vector<1x8xf32>
      %cst_153 = arith.constant 1.000000e+00 : f32
      %543 = vector.broadcast %cst_153 : f32 to vector<1x8xf32>
      %544 = arith.divf %543, %542 : vector<1x8xf32>
      %545 = vector.broadcast %519 : vector<8x1xf32> to vector<8x8xf32>
      %546 = arith.subf %16, %545 : vector<8x8xf32>
      %547 = vector.broadcast %520 : vector<1x8xf32> to vector<8x8xf32>
      %548 = arith.subf %546, %547 : vector<8x8xf32>
      %549 = vector.broadcast %518 : vector<1x1xf32> to vector<8x8xf32>
      %550 = arith.addf %548, %549 : vector<8x8xf32>
      %551 = vector.broadcast %539 : vector<8x1xf32> to vector<8x8xf32>
      %552 = arith.mulf %550, %551 : vector<8x8xf32>
      %553 = vector.broadcast %544 : vector<1x8xf32> to vector<8x8xf32>
      %554 = arith.mulf %552, %553 : vector<8x8xf32>
      %c4_i32 = arith.constant 4 : i32
      %555 = vector.broadcast %c4_i32 : i32 to vector<8x8xi32>
      %556 = arith.cmpi ne, %18, %555 : vector<8x8xi32>
      %c4_i32_154 = arith.constant 4 : i32
      %557 = vector.broadcast %c4_i32_154 : i32 to vector<8x8xi32>
      %558 = arith.cmpi ne, %19, %557 : vector<8x8xi32>
      %559 = arith.andi %556, %558 : vector<8x8xi1>
      %cst_155 = arith.constant 0.000000e+00 : f32
      %560 = vector.broadcast %cst_155 : f32 to vector<8x8xf32>
      %561 = arith.select %559, %554, %560 : vector<8x8xi1>, vector<8x8xf32>
      %562 = vector.extract_strided_slice %59 {offsets = [4, 0], sizes = [1, 1], strides = [1, 1]} : vector<8x1xf32> to vector<1x1xf32>
      %563 = vector.extract_strided_slice %17 {offsets = [0, 4], sizes = [8, 1], strides = [1, 1]} : vector<8x8xf32> to vector<8x1xf32>
      %564 = vector.extract_strided_slice %17 {offsets = [4, 0], sizes = [1, 8], strides = [1, 1]} : vector<8x8xf32> to vector<1x8xf32>
      %565 = vector.broadcast %562 : vector<1x1xf32> to vector<8x1xf32>
      %566 = arith.addf %59, %565 : vector<8x1xf32>
      %cst_156 = arith.constant 2.000000e+00 : f32
      %567 = vector.broadcast %cst_156 : f32 to vector<8x1xf32>
      %568 = arith.mulf %567, %563 : vector<8x1xf32>
      %569 = arith.subf %566, %568 : vector<8x1xf32>
      %cst_157 = arith.constant 0.000000e+00 : f32
      %570 = vector.broadcast %cst_157 : f32 to vector<8x1xf32>
      %571 = arith.maximumf %569, %570 : vector<8x1xf32>
      %572 = vector.broadcast %562 : vector<1x1xf32> to vector<1x8xf32>
      %573 = arith.addf %63, %572 : vector<1x8xf32>
      %cst_158 = arith.constant 2.000000e+00 : f32
      %574 = vector.broadcast %cst_158 : f32 to vector<1x8xf32>
      %575 = arith.mulf %574, %564 : vector<1x8xf32>
      %576 = arith.subf %573, %575 : vector<1x8xf32>
      %cst_159 = arith.constant 0.000000e+00 : f32
      %577 = vector.broadcast %cst_159 : f32 to vector<1x8xf32>
      %578 = arith.maximumf %576, %577 : vector<1x8xf32>
      %579 = math.sqrt %571 : vector<8x1xf32>
      %cst_160 = arith.constant 9.99999996E-13 : f32
      %580 = vector.broadcast %cst_160 : f32 to vector<8x1xf32>
      %581 = arith.maximumf %579, %580 : vector<8x1xf32>
      %cst_161 = arith.constant 1.000000e+00 : f32
      %582 = vector.broadcast %cst_161 : f32 to vector<8x1xf32>
      %583 = arith.divf %582, %581 : vector<8x1xf32>
      %584 = math.sqrt %578 : vector<1x8xf32>
      %cst_162 = arith.constant 9.99999996E-13 : f32
      %585 = vector.broadcast %cst_162 : f32 to vector<1x8xf32>
      %586 = arith.maximumf %584, %585 : vector<1x8xf32>
      %cst_163 = arith.constant 1.000000e+00 : f32
      %587 = vector.broadcast %cst_163 : f32 to vector<1x8xf32>
      %588 = arith.divf %587, %586 : vector<1x8xf32>
      %589 = vector.broadcast %563 : vector<8x1xf32> to vector<8x8xf32>
      %590 = arith.subf %17, %589 : vector<8x8xf32>
      %591 = vector.broadcast %564 : vector<1x8xf32> to vector<8x8xf32>
      %592 = arith.subf %590, %591 : vector<8x8xf32>
      %593 = vector.broadcast %562 : vector<1x1xf32> to vector<8x8xf32>
      %594 = arith.addf %592, %593 : vector<8x8xf32>
      %595 = vector.broadcast %583 : vector<8x1xf32> to vector<8x8xf32>
      %596 = arith.mulf %594, %595 : vector<8x8xf32>
      %597 = vector.broadcast %588 : vector<1x8xf32> to vector<8x8xf32>
      %598 = arith.mulf %596, %597 : vector<8x8xf32>
      %c4_i32_164 = arith.constant 4 : i32
      %599 = vector.broadcast %c4_i32_164 : i32 to vector<8x8xi32>
      %600 = arith.cmpi ne, %18, %599 : vector<8x8xi32>
      %c4_i32_165 = arith.constant 4 : i32
      %601 = vector.broadcast %c4_i32_165 : i32 to vector<8x8xi32>
      %602 = arith.cmpi ne, %19, %601 : vector<8x8xi32>
      %603 = arith.andi %600, %602 : vector<8x8xi1>
      %cst_166 = arith.constant 0.000000e+00 : f32
      %604 = vector.broadcast %cst_166 : f32 to vector<8x8xf32>
      %605 = arith.select %603, %598, %604 : vector<8x8xi1>, vector<8x8xf32>
      %606 = arith.subf %561, %605 : vector<8x8xf32>
      %607 = math.absf %606 : vector<8x8xf32>
      %cst_167 = arith.constant 1.000000e+00 : f32
      %608 = vector.broadcast %cst_167 : f32 to vector<8x8xf32>
      %609 = arith.cmpf olt, %607, %608 : vector<8x8xf32>
      %cst_168 = arith.constant 5.000000e-01 : f32
      %610 = vector.broadcast %cst_168 : f32 to vector<8x8xf32>
      %611 = arith.mulf %610, %606 : vector<8x8xf32>
      %612 = arith.mulf %611, %606 : vector<8x8xf32>
      %cst_169 = arith.constant 5.000000e-01 : f32
      %613 = vector.broadcast %cst_169 : f32 to vector<8x8xf32>
      %614 = arith.subf %607, %613 : vector<8x8xf32>
      %615 = arith.select %609, %612, %614 : vector<8x8xi1>, vector<8x8xf32>
      %616 = vector.shape_cast %615 : vector<8x8xf32> to vector<1x8x8xf32>
      %cst_170 = arith.constant dense<0.000000e+00> : vector<1xf32>
      %617 = vector.multi_reduction <add>, %616, %cst_170 [1, 2] : vector<1x8x8xf32> to vector<1xf32>
      %618 = vector.shape_cast %617 : vector<1xf32> to vector<1x1x1xf32>
      %619 = vector.extract %618[0, 0, 0] : f32 from vector<1x1x1xf32>
      %620 = arith.addf %517, %619 : f32
      %621 = vector.extract_strided_slice %24 {offsets = [5, 0], sizes = [1, 1], strides = [1, 1]} : vector<8x1xf32> to vector<1x1xf32>
      %622 = vector.extract_strided_slice %16 {offsets = [0, 5], sizes = [8, 1], strides = [1, 1]} : vector<8x8xf32> to vector<8x1xf32>
      %623 = vector.extract_strided_slice %16 {offsets = [5, 0], sizes = [1, 8], strides = [1, 1]} : vector<8x8xf32> to vector<1x8xf32>
      %624 = vector.broadcast %621 : vector<1x1xf32> to vector<8x1xf32>
      %625 = arith.addf %24, %624 : vector<8x1xf32>
      %cst_171 = arith.constant 2.000000e+00 : f32
      %626 = vector.broadcast %cst_171 : f32 to vector<8x1xf32>
      %627 = arith.mulf %626, %622 : vector<8x1xf32>
      %628 = arith.subf %625, %627 : vector<8x1xf32>
      %cst_172 = arith.constant 0.000000e+00 : f32
      %629 = vector.broadcast %cst_172 : f32 to vector<8x1xf32>
      %630 = arith.maximumf %628, %629 : vector<8x1xf32>
      %631 = vector.broadcast %621 : vector<1x1xf32> to vector<1x8xf32>
      %632 = arith.addf %28, %631 : vector<1x8xf32>
      %cst_173 = arith.constant 2.000000e+00 : f32
      %633 = vector.broadcast %cst_173 : f32 to vector<1x8xf32>
      %634 = arith.mulf %633, %623 : vector<1x8xf32>
      %635 = arith.subf %632, %634 : vector<1x8xf32>
      %cst_174 = arith.constant 0.000000e+00 : f32
      %636 = vector.broadcast %cst_174 : f32 to vector<1x8xf32>
      %637 = arith.maximumf %635, %636 : vector<1x8xf32>
      %638 = math.sqrt %630 : vector<8x1xf32>
      %cst_175 = arith.constant 9.99999996E-13 : f32
      %639 = vector.broadcast %cst_175 : f32 to vector<8x1xf32>
      %640 = arith.maximumf %638, %639 : vector<8x1xf32>
      %cst_176 = arith.constant 1.000000e+00 : f32
      %641 = vector.broadcast %cst_176 : f32 to vector<8x1xf32>
      %642 = arith.divf %641, %640 : vector<8x1xf32>
      %643 = math.sqrt %637 : vector<1x8xf32>
      %cst_177 = arith.constant 9.99999996E-13 : f32
      %644 = vector.broadcast %cst_177 : f32 to vector<1x8xf32>
      %645 = arith.maximumf %643, %644 : vector<1x8xf32>
      %cst_178 = arith.constant 1.000000e+00 : f32
      %646 = vector.broadcast %cst_178 : f32 to vector<1x8xf32>
      %647 = arith.divf %646, %645 : vector<1x8xf32>
      %648 = vector.broadcast %622 : vector<8x1xf32> to vector<8x8xf32>
      %649 = arith.subf %16, %648 : vector<8x8xf32>
      %650 = vector.broadcast %623 : vector<1x8xf32> to vector<8x8xf32>
      %651 = arith.subf %649, %650 : vector<8x8xf32>
      %652 = vector.broadcast %621 : vector<1x1xf32> to vector<8x8xf32>
      %653 = arith.addf %651, %652 : vector<8x8xf32>
      %654 = vector.broadcast %642 : vector<8x1xf32> to vector<8x8xf32>
      %655 = arith.mulf %653, %654 : vector<8x8xf32>
      %656 = vector.broadcast %647 : vector<1x8xf32> to vector<8x8xf32>
      %657 = arith.mulf %655, %656 : vector<8x8xf32>
      %c5_i32 = arith.constant 5 : i32
      %658 = vector.broadcast %c5_i32 : i32 to vector<8x8xi32>
      %659 = arith.cmpi ne, %18, %658 : vector<8x8xi32>
      %c5_i32_179 = arith.constant 5 : i32
      %660 = vector.broadcast %c5_i32_179 : i32 to vector<8x8xi32>
      %661 = arith.cmpi ne, %19, %660 : vector<8x8xi32>
      %662 = arith.andi %659, %661 : vector<8x8xi1>
      %cst_180 = arith.constant 0.000000e+00 : f32
      %663 = vector.broadcast %cst_180 : f32 to vector<8x8xf32>
      %664 = arith.select %662, %657, %663 : vector<8x8xi1>, vector<8x8xf32>
      %665 = vector.extract_strided_slice %59 {offsets = [5, 0], sizes = [1, 1], strides = [1, 1]} : vector<8x1xf32> to vector<1x1xf32>
      %666 = vector.extract_strided_slice %17 {offsets = [0, 5], sizes = [8, 1], strides = [1, 1]} : vector<8x8xf32> to vector<8x1xf32>
      %667 = vector.extract_strided_slice %17 {offsets = [5, 0], sizes = [1, 8], strides = [1, 1]} : vector<8x8xf32> to vector<1x8xf32>
      %668 = vector.broadcast %665 : vector<1x1xf32> to vector<8x1xf32>
      %669 = arith.addf %59, %668 : vector<8x1xf32>
      %cst_181 = arith.constant 2.000000e+00 : f32
      %670 = vector.broadcast %cst_181 : f32 to vector<8x1xf32>
      %671 = arith.mulf %670, %666 : vector<8x1xf32>
      %672 = arith.subf %669, %671 : vector<8x1xf32>
      %cst_182 = arith.constant 0.000000e+00 : f32
      %673 = vector.broadcast %cst_182 : f32 to vector<8x1xf32>
      %674 = arith.maximumf %672, %673 : vector<8x1xf32>
      %675 = vector.broadcast %665 : vector<1x1xf32> to vector<1x8xf32>
      %676 = arith.addf %63, %675 : vector<1x8xf32>
      %cst_183 = arith.constant 2.000000e+00 : f32
      %677 = vector.broadcast %cst_183 : f32 to vector<1x8xf32>
      %678 = arith.mulf %677, %667 : vector<1x8xf32>
      %679 = arith.subf %676, %678 : vector<1x8xf32>
      %cst_184 = arith.constant 0.000000e+00 : f32
      %680 = vector.broadcast %cst_184 : f32 to vector<1x8xf32>
      %681 = arith.maximumf %679, %680 : vector<1x8xf32>
      %682 = math.sqrt %674 : vector<8x1xf32>
      %cst_185 = arith.constant 9.99999996E-13 : f32
      %683 = vector.broadcast %cst_185 : f32 to vector<8x1xf32>
      %684 = arith.maximumf %682, %683 : vector<8x1xf32>
      %cst_186 = arith.constant 1.000000e+00 : f32
      %685 = vector.broadcast %cst_186 : f32 to vector<8x1xf32>
      %686 = arith.divf %685, %684 : vector<8x1xf32>
      %687 = math.sqrt %681 : vector<1x8xf32>
      %cst_187 = arith.constant 9.99999996E-13 : f32
      %688 = vector.broadcast %cst_187 : f32 to vector<1x8xf32>
      %689 = arith.maximumf %687, %688 : vector<1x8xf32>
      %cst_188 = arith.constant 1.000000e+00 : f32
      %690 = vector.broadcast %cst_188 : f32 to vector<1x8xf32>
      %691 = arith.divf %690, %689 : vector<1x8xf32>
      %692 = vector.broadcast %666 : vector<8x1xf32> to vector<8x8xf32>
      %693 = arith.subf %17, %692 : vector<8x8xf32>
      %694 = vector.broadcast %667 : vector<1x8xf32> to vector<8x8xf32>
      %695 = arith.subf %693, %694 : vector<8x8xf32>
      %696 = vector.broadcast %665 : vector<1x1xf32> to vector<8x8xf32>
      %697 = arith.addf %695, %696 : vector<8x8xf32>
      %698 = vector.broadcast %686 : vector<8x1xf32> to vector<8x8xf32>
      %699 = arith.mulf %697, %698 : vector<8x8xf32>
      %700 = vector.broadcast %691 : vector<1x8xf32> to vector<8x8xf32>
      %701 = arith.mulf %699, %700 : vector<8x8xf32>
      %c5_i32_189 = arith.constant 5 : i32
      %702 = vector.broadcast %c5_i32_189 : i32 to vector<8x8xi32>
      %703 = arith.cmpi ne, %18, %702 : vector<8x8xi32>
      %c5_i32_190 = arith.constant 5 : i32
      %704 = vector.broadcast %c5_i32_190 : i32 to vector<8x8xi32>
      %705 = arith.cmpi ne, %19, %704 : vector<8x8xi32>
      %706 = arith.andi %703, %705 : vector<8x8xi1>
      %cst_191 = arith.constant 0.000000e+00 : f32
      %707 = vector.broadcast %cst_191 : f32 to vector<8x8xf32>
      %708 = arith.select %706, %701, %707 : vector<8x8xi1>, vector<8x8xf32>
      %709 = arith.subf %664, %708 : vector<8x8xf32>
      %710 = math.absf %709 : vector<8x8xf32>
      %cst_192 = arith.constant 1.000000e+00 : f32
      %711 = vector.broadcast %cst_192 : f32 to vector<8x8xf32>
      %712 = arith.cmpf olt, %710, %711 : vector<8x8xf32>
      %cst_193 = arith.constant 5.000000e-01 : f32
      %713 = vector.broadcast %cst_193 : f32 to vector<8x8xf32>
      %714 = arith.mulf %713, %709 : vector<8x8xf32>
      %715 = arith.mulf %714, %709 : vector<8x8xf32>
      %cst_194 = arith.constant 5.000000e-01 : f32
      %716 = vector.broadcast %cst_194 : f32 to vector<8x8xf32>
      %717 = arith.subf %710, %716 : vector<8x8xf32>
      %718 = arith.select %712, %715, %717 : vector<8x8xi1>, vector<8x8xf32>
      %719 = vector.shape_cast %718 : vector<8x8xf32> to vector<1x8x8xf32>
      %cst_195 = arith.constant dense<0.000000e+00> : vector<1xf32>
      %720 = vector.multi_reduction <add>, %719, %cst_195 [1, 2] : vector<1x8x8xf32> to vector<1xf32>
      %721 = vector.shape_cast %720 : vector<1xf32> to vector<1x1x1xf32>
      %722 = vector.extract %721[0, 0, 0] : f32 from vector<1x1x1xf32>
      %723 = arith.addf %620, %722 : f32
      %724 = vector.extract_strided_slice %24 {offsets = [6, 0], sizes = [1, 1], strides = [1, 1]} : vector<8x1xf32> to vector<1x1xf32>
      %725 = vector.extract_strided_slice %16 {offsets = [0, 6], sizes = [8, 1], strides = [1, 1]} : vector<8x8xf32> to vector<8x1xf32>
      %726 = vector.extract_strided_slice %16 {offsets = [6, 0], sizes = [1, 8], strides = [1, 1]} : vector<8x8xf32> to vector<1x8xf32>
      %727 = vector.broadcast %724 : vector<1x1xf32> to vector<8x1xf32>
      %728 = arith.addf %24, %727 : vector<8x1xf32>
      %cst_196 = arith.constant 2.000000e+00 : f32
      %729 = vector.broadcast %cst_196 : f32 to vector<8x1xf32>
      %730 = arith.mulf %729, %725 : vector<8x1xf32>
      %731 = arith.subf %728, %730 : vector<8x1xf32>
      %cst_197 = arith.constant 0.000000e+00 : f32
      %732 = vector.broadcast %cst_197 : f32 to vector<8x1xf32>
      %733 = arith.maximumf %731, %732 : vector<8x1xf32>
      %734 = vector.broadcast %724 : vector<1x1xf32> to vector<1x8xf32>
      %735 = arith.addf %28, %734 : vector<1x8xf32>
      %cst_198 = arith.constant 2.000000e+00 : f32
      %736 = vector.broadcast %cst_198 : f32 to vector<1x8xf32>
      %737 = arith.mulf %736, %726 : vector<1x8xf32>
      %738 = arith.subf %735, %737 : vector<1x8xf32>
      %cst_199 = arith.constant 0.000000e+00 : f32
      %739 = vector.broadcast %cst_199 : f32 to vector<1x8xf32>
      %740 = arith.maximumf %738, %739 : vector<1x8xf32>
      %741 = math.sqrt %733 : vector<8x1xf32>
      %cst_200 = arith.constant 9.99999996E-13 : f32
      %742 = vector.broadcast %cst_200 : f32 to vector<8x1xf32>
      %743 = arith.maximumf %741, %742 : vector<8x1xf32>
      %cst_201 = arith.constant 1.000000e+00 : f32
      %744 = vector.broadcast %cst_201 : f32 to vector<8x1xf32>
      %745 = arith.divf %744, %743 : vector<8x1xf32>
      %746 = math.sqrt %740 : vector<1x8xf32>
      %cst_202 = arith.constant 9.99999996E-13 : f32
      %747 = vector.broadcast %cst_202 : f32 to vector<1x8xf32>
      %748 = arith.maximumf %746, %747 : vector<1x8xf32>
      %cst_203 = arith.constant 1.000000e+00 : f32
      %749 = vector.broadcast %cst_203 : f32 to vector<1x8xf32>
      %750 = arith.divf %749, %748 : vector<1x8xf32>
      %751 = vector.broadcast %725 : vector<8x1xf32> to vector<8x8xf32>
      %752 = arith.subf %16, %751 : vector<8x8xf32>
      %753 = vector.broadcast %726 : vector<1x8xf32> to vector<8x8xf32>
      %754 = arith.subf %752, %753 : vector<8x8xf32>
      %755 = vector.broadcast %724 : vector<1x1xf32> to vector<8x8xf32>
      %756 = arith.addf %754, %755 : vector<8x8xf32>
      %757 = vector.broadcast %745 : vector<8x1xf32> to vector<8x8xf32>
      %758 = arith.mulf %756, %757 : vector<8x8xf32>
      %759 = vector.broadcast %750 : vector<1x8xf32> to vector<8x8xf32>
      %760 = arith.mulf %758, %759 : vector<8x8xf32>
      %c6_i32 = arith.constant 6 : i32
      %761 = vector.broadcast %c6_i32 : i32 to vector<8x8xi32>
      %762 = arith.cmpi ne, %18, %761 : vector<8x8xi32>
      %c6_i32_204 = arith.constant 6 : i32
      %763 = vector.broadcast %c6_i32_204 : i32 to vector<8x8xi32>
      %764 = arith.cmpi ne, %19, %763 : vector<8x8xi32>
      %765 = arith.andi %762, %764 : vector<8x8xi1>
      %cst_205 = arith.constant 0.000000e+00 : f32
      %766 = vector.broadcast %cst_205 : f32 to vector<8x8xf32>
      %767 = arith.select %765, %760, %766 : vector<8x8xi1>, vector<8x8xf32>
      %768 = vector.extract_strided_slice %59 {offsets = [6, 0], sizes = [1, 1], strides = [1, 1]} : vector<8x1xf32> to vector<1x1xf32>
      %769 = vector.extract_strided_slice %17 {offsets = [0, 6], sizes = [8, 1], strides = [1, 1]} : vector<8x8xf32> to vector<8x1xf32>
      %770 = vector.extract_strided_slice %17 {offsets = [6, 0], sizes = [1, 8], strides = [1, 1]} : vector<8x8xf32> to vector<1x8xf32>
      %771 = vector.broadcast %768 : vector<1x1xf32> to vector<8x1xf32>
      %772 = arith.addf %59, %771 : vector<8x1xf32>
      %cst_206 = arith.constant 2.000000e+00 : f32
      %773 = vector.broadcast %cst_206 : f32 to vector<8x1xf32>
      %774 = arith.mulf %773, %769 : vector<8x1xf32>
      %775 = arith.subf %772, %774 : vector<8x1xf32>
      %cst_207 = arith.constant 0.000000e+00 : f32
      %776 = vector.broadcast %cst_207 : f32 to vector<8x1xf32>
      %777 = arith.maximumf %775, %776 : vector<8x1xf32>
      %778 = vector.broadcast %768 : vector<1x1xf32> to vector<1x8xf32>
      %779 = arith.addf %63, %778 : vector<1x8xf32>
      %cst_208 = arith.constant 2.000000e+00 : f32
      %780 = vector.broadcast %cst_208 : f32 to vector<1x8xf32>
      %781 = arith.mulf %780, %770 : vector<1x8xf32>
      %782 = arith.subf %779, %781 : vector<1x8xf32>
      %cst_209 = arith.constant 0.000000e+00 : f32
      %783 = vector.broadcast %cst_209 : f32 to vector<1x8xf32>
      %784 = arith.maximumf %782, %783 : vector<1x8xf32>
      %785 = math.sqrt %777 : vector<8x1xf32>
      %cst_210 = arith.constant 9.99999996E-13 : f32
      %786 = vector.broadcast %cst_210 : f32 to vector<8x1xf32>
      %787 = arith.maximumf %785, %786 : vector<8x1xf32>
      %cst_211 = arith.constant 1.000000e+00 : f32
      %788 = vector.broadcast %cst_211 : f32 to vector<8x1xf32>
      %789 = arith.divf %788, %787 : vector<8x1xf32>
      %790 = math.sqrt %784 : vector<1x8xf32>
      %cst_212 = arith.constant 9.99999996E-13 : f32
      %791 = vector.broadcast %cst_212 : f32 to vector<1x8xf32>
      %792 = arith.maximumf %790, %791 : vector<1x8xf32>
      %cst_213 = arith.constant 1.000000e+00 : f32
      %793 = vector.broadcast %cst_213 : f32 to vector<1x8xf32>
      %794 = arith.divf %793, %792 : vector<1x8xf32>
      %795 = vector.broadcast %769 : vector<8x1xf32> to vector<8x8xf32>
      %796 = arith.subf %17, %795 : vector<8x8xf32>
      %797 = vector.broadcast %770 : vector<1x8xf32> to vector<8x8xf32>
      %798 = arith.subf %796, %797 : vector<8x8xf32>
      %799 = vector.broadcast %768 : vector<1x1xf32> to vector<8x8xf32>
      %800 = arith.addf %798, %799 : vector<8x8xf32>
      %801 = vector.broadcast %789 : vector<8x1xf32> to vector<8x8xf32>
      %802 = arith.mulf %800, %801 : vector<8x8xf32>
      %803 = vector.broadcast %794 : vector<1x8xf32> to vector<8x8xf32>
      %804 = arith.mulf %802, %803 : vector<8x8xf32>
      %c6_i32_214 = arith.constant 6 : i32
      %805 = vector.broadcast %c6_i32_214 : i32 to vector<8x8xi32>
      %806 = arith.cmpi ne, %18, %805 : vector<8x8xi32>
      %c6_i32_215 = arith.constant 6 : i32
      %807 = vector.broadcast %c6_i32_215 : i32 to vector<8x8xi32>
      %808 = arith.cmpi ne, %19, %807 : vector<8x8xi32>
      %809 = arith.andi %806, %808 : vector<8x8xi1>
      %cst_216 = arith.constant 0.000000e+00 : f32
      %810 = vector.broadcast %cst_216 : f32 to vector<8x8xf32>
      %811 = arith.select %809, %804, %810 : vector<8x8xi1>, vector<8x8xf32>
      %812 = arith.subf %767, %811 : vector<8x8xf32>
      %813 = math.absf %812 : vector<8x8xf32>
      %cst_217 = arith.constant 1.000000e+00 : f32
      %814 = vector.broadcast %cst_217 : f32 to vector<8x8xf32>
      %815 = arith.cmpf olt, %813, %814 : vector<8x8xf32>
      %cst_218 = arith.constant 5.000000e-01 : f32
      %816 = vector.broadcast %cst_218 : f32 to vector<8x8xf32>
      %817 = arith.mulf %816, %812 : vector<8x8xf32>
      %818 = arith.mulf %817, %812 : vector<8x8xf32>
      %cst_219 = arith.constant 5.000000e-01 : f32
      %819 = vector.broadcast %cst_219 : f32 to vector<8x8xf32>
      %820 = arith.subf %813, %819 : vector<8x8xf32>
      %821 = arith.select %815, %818, %820 : vector<8x8xi1>, vector<8x8xf32>
      %822 = vector.shape_cast %821 : vector<8x8xf32> to vector<1x8x8xf32>
      %cst_220 = arith.constant dense<0.000000e+00> : vector<1xf32>
      %823 = vector.multi_reduction <add>, %822, %cst_220 [1, 2] : vector<1x8x8xf32> to vector<1xf32>
      %824 = vector.shape_cast %823 : vector<1xf32> to vector<1x1x1xf32>
      %825 = vector.extract %824[0, 0, 0] : f32 from vector<1x1x1xf32>
      %826 = arith.addf %723, %825 : f32
      %827 = vector.extract_strided_slice %24 {offsets = [7, 0], sizes = [1, 1], strides = [1, 1]} : vector<8x1xf32> to vector<1x1xf32>
      %828 = vector.extract_strided_slice %16 {offsets = [0, 7], sizes = [8, 1], strides = [1, 1]} : vector<8x8xf32> to vector<8x1xf32>
      %829 = vector.extract_strided_slice %16 {offsets = [7, 0], sizes = [1, 8], strides = [1, 1]} : vector<8x8xf32> to vector<1x8xf32>
      %830 = vector.broadcast %827 : vector<1x1xf32> to vector<8x1xf32>
      %831 = arith.addf %24, %830 : vector<8x1xf32>
      %cst_221 = arith.constant 2.000000e+00 : f32
      %832 = vector.broadcast %cst_221 : f32 to vector<8x1xf32>
      %833 = arith.mulf %832, %828 : vector<8x1xf32>
      %834 = arith.subf %831, %833 : vector<8x1xf32>
      %cst_222 = arith.constant 0.000000e+00 : f32
      %835 = vector.broadcast %cst_222 : f32 to vector<8x1xf32>
      %836 = arith.maximumf %834, %835 : vector<8x1xf32>
      %837 = vector.broadcast %827 : vector<1x1xf32> to vector<1x8xf32>
      %838 = arith.addf %28, %837 : vector<1x8xf32>
      %cst_223 = arith.constant 2.000000e+00 : f32
      %839 = vector.broadcast %cst_223 : f32 to vector<1x8xf32>
      %840 = arith.mulf %839, %829 : vector<1x8xf32>
      %841 = arith.subf %838, %840 : vector<1x8xf32>
      %cst_224 = arith.constant 0.000000e+00 : f32
      %842 = vector.broadcast %cst_224 : f32 to vector<1x8xf32>
      %843 = arith.maximumf %841, %842 : vector<1x8xf32>
      %844 = math.sqrt %836 : vector<8x1xf32>
      %cst_225 = arith.constant 9.99999996E-13 : f32
      %845 = vector.broadcast %cst_225 : f32 to vector<8x1xf32>
      %846 = arith.maximumf %844, %845 : vector<8x1xf32>
      %cst_226 = arith.constant 1.000000e+00 : f32
      %847 = vector.broadcast %cst_226 : f32 to vector<8x1xf32>
      %848 = arith.divf %847, %846 : vector<8x1xf32>
      %849 = math.sqrt %843 : vector<1x8xf32>
      %cst_227 = arith.constant 9.99999996E-13 : f32
      %850 = vector.broadcast %cst_227 : f32 to vector<1x8xf32>
      %851 = arith.maximumf %849, %850 : vector<1x8xf32>
      %cst_228 = arith.constant 1.000000e+00 : f32
      %852 = vector.broadcast %cst_228 : f32 to vector<1x8xf32>
      %853 = arith.divf %852, %851 : vector<1x8xf32>
      %854 = vector.broadcast %828 : vector<8x1xf32> to vector<8x8xf32>
      %855 = arith.subf %16, %854 : vector<8x8xf32>
      %856 = vector.broadcast %829 : vector<1x8xf32> to vector<8x8xf32>
      %857 = arith.subf %855, %856 : vector<8x8xf32>
      %858 = vector.broadcast %827 : vector<1x1xf32> to vector<8x8xf32>
      %859 = arith.addf %857, %858 : vector<8x8xf32>
      %860 = vector.broadcast %848 : vector<8x1xf32> to vector<8x8xf32>
      %861 = arith.mulf %859, %860 : vector<8x8xf32>
      %862 = vector.broadcast %853 : vector<1x8xf32> to vector<8x8xf32>
      %863 = arith.mulf %861, %862 : vector<8x8xf32>
      %c7_i32 = arith.constant 7 : i32
      %864 = vector.broadcast %c7_i32 : i32 to vector<8x8xi32>
      %865 = arith.cmpi ne, %18, %864 : vector<8x8xi32>
      %c7_i32_229 = arith.constant 7 : i32
      %866 = vector.broadcast %c7_i32_229 : i32 to vector<8x8xi32>
      %867 = arith.cmpi ne, %19, %866 : vector<8x8xi32>
      %868 = arith.andi %865, %867 : vector<8x8xi1>
      %cst_230 = arith.constant 0.000000e+00 : f32
      %869 = vector.broadcast %cst_230 : f32 to vector<8x8xf32>
      %870 = arith.select %868, %863, %869 : vector<8x8xi1>, vector<8x8xf32>
      %871 = vector.extract_strided_slice %59 {offsets = [7, 0], sizes = [1, 1], strides = [1, 1]} : vector<8x1xf32> to vector<1x1xf32>
      %872 = vector.extract_strided_slice %17 {offsets = [0, 7], sizes = [8, 1], strides = [1, 1]} : vector<8x8xf32> to vector<8x1xf32>
      %873 = vector.extract_strided_slice %17 {offsets = [7, 0], sizes = [1, 8], strides = [1, 1]} : vector<8x8xf32> to vector<1x8xf32>
      %874 = vector.broadcast %871 : vector<1x1xf32> to vector<8x1xf32>
      %875 = arith.addf %59, %874 : vector<8x1xf32>
      %cst_231 = arith.constant 2.000000e+00 : f32
      %876 = vector.broadcast %cst_231 : f32 to vector<8x1xf32>
      %877 = arith.mulf %876, %872 : vector<8x1xf32>
      %878 = arith.subf %875, %877 : vector<8x1xf32>
      %cst_232 = arith.constant 0.000000e+00 : f32
      %879 = vector.broadcast %cst_232 : f32 to vector<8x1xf32>
      %880 = arith.maximumf %878, %879 : vector<8x1xf32>
      %881 = vector.broadcast %871 : vector<1x1xf32> to vector<1x8xf32>
      %882 = arith.addf %63, %881 : vector<1x8xf32>
      %cst_233 = arith.constant 2.000000e+00 : f32
      %883 = vector.broadcast %cst_233 : f32 to vector<1x8xf32>
      %884 = arith.mulf %883, %873 : vector<1x8xf32>
      %885 = arith.subf %882, %884 : vector<1x8xf32>
      %cst_234 = arith.constant 0.000000e+00 : f32
      %886 = vector.broadcast %cst_234 : f32 to vector<1x8xf32>
      %887 = arith.maximumf %885, %886 : vector<1x8xf32>
      %888 = math.sqrt %880 : vector<8x1xf32>
      %cst_235 = arith.constant 9.99999996E-13 : f32
      %889 = vector.broadcast %cst_235 : f32 to vector<8x1xf32>
      %890 = arith.maximumf %888, %889 : vector<8x1xf32>
      %cst_236 = arith.constant 1.000000e+00 : f32
      %891 = vector.broadcast %cst_236 : f32 to vector<8x1xf32>
      %892 = arith.divf %891, %890 : vector<8x1xf32>
      %893 = math.sqrt %887 : vector<1x8xf32>
      %cst_237 = arith.constant 9.99999996E-13 : f32
      %894 = vector.broadcast %cst_237 : f32 to vector<1x8xf32>
      %895 = arith.maximumf %893, %894 : vector<1x8xf32>
      %cst_238 = arith.constant 1.000000e+00 : f32
      %896 = vector.broadcast %cst_238 : f32 to vector<1x8xf32>
      %897 = arith.divf %896, %895 : vector<1x8xf32>
      %898 = vector.broadcast %872 : vector<8x1xf32> to vector<8x8xf32>
      %899 = arith.subf %17, %898 : vector<8x8xf32>
      %900 = vector.broadcast %873 : vector<1x8xf32> to vector<8x8xf32>
      %901 = arith.subf %899, %900 : vector<8x8xf32>
      %902 = vector.broadcast %871 : vector<1x1xf32> to vector<8x8xf32>
      %903 = arith.addf %901, %902 : vector<8x8xf32>
      %904 = vector.broadcast %892 : vector<8x1xf32> to vector<8x8xf32>
      %905 = arith.mulf %903, %904 : vector<8x8xf32>
      %906 = vector.broadcast %897 : vector<1x8xf32> to vector<8x8xf32>
      %907 = arith.mulf %905, %906 : vector<8x8xf32>
      %c7_i32_239 = arith.constant 7 : i32
      %908 = vector.broadcast %c7_i32_239 : i32 to vector<8x8xi32>
      %909 = arith.cmpi ne, %18, %908 : vector<8x8xi32>
      %c7_i32_240 = arith.constant 7 : i32
      %910 = vector.broadcast %c7_i32_240 : i32 to vector<8x8xi32>
      %911 = arith.cmpi ne, %19, %910 : vector<8x8xi32>
      %912 = arith.andi %909, %911 : vector<8x8xi1>
      %cst_241 = arith.constant 0.000000e+00 : f32
      %913 = vector.broadcast %cst_241 : f32 to vector<8x8xf32>
      %914 = arith.select %912, %907, %913 : vector<8x8xi1>, vector<8x8xf32>
      %915 = arith.subf %870, %914 : vector<8x8xf32>
      %916 = math.absf %915 : vector<8x8xf32>
      %cst_242 = arith.constant 1.000000e+00 : f32
      %917 = vector.broadcast %cst_242 : f32 to vector<8x8xf32>
      %918 = arith.cmpf olt, %916, %917 : vector<8x8xf32>
      %cst_243 = arith.constant 5.000000e-01 : f32
      %919 = vector.broadcast %cst_243 : f32 to vector<8x8xf32>
      %920 = arith.mulf %919, %915 : vector<8x8xf32>
      %921 = arith.mulf %920, %915 : vector<8x8xf32>
      %cst_244 = arith.constant 5.000000e-01 : f32
      %922 = vector.broadcast %cst_244 : f32 to vector<8x8xf32>
      %923 = arith.subf %916, %922 : vector<8x8xf32>
      %924 = arith.select %918, %921, %923 : vector<8x8xi1>, vector<8x8xf32>
      %925 = vector.shape_cast %924 : vector<8x8xf32> to vector<1x8x8xf32>
      %cst_245 = arith.constant dense<0.000000e+00> : vector<1xf32>
      %926 = vector.multi_reduction <add>, %925, %cst_245 [1, 2] : vector<1x8x8xf32> to vector<1xf32>
      %927 = vector.shape_cast %926 : vector<1xf32> to vector<1x1x1xf32>
      %928 = vector.extract %927[0, 0, 0] : f32 from vector<1x1x1xf32>
      %929 = arith.addf %826, %928 : f32
      %cst_246 = arith.constant 5.120000e+02 : f32
      %930 = arith.divf %929, %cst_246 : f32
      %cst_247 = arith.constant 2.500000e+01 : f32
      %931 = arith.mulf %cst_247, %105 : f32
      %cst_248 = arith.constant 5.000000e+01 : f32
      %932 = arith.mulf %cst_248, %930 : f32
      %933 = arith.addf %931, %932 : f32
      %c0_249 = arith.constant 0 : index
      %c0_250 = arith.constant 0 : index
      %934 = memref.load %arg3[%c0_249, %c0_250] : memref<1x1xf32, #tpu.memory_space<smem>>
      memref.store %933, %arg3[%c0_249, %c0_250] : memref<1x1xf32, #tpu.memory_space<smem>>
    } else {
    }
    return
  }
  func.func @transform_0(%arg0: i32) -> (i32, i32) {
    %c0_i32 = arith.constant 0 : i32
    %c0_i32_0 = arith.constant 0 : i32
    return %c0_i32, %arg0 : i32, i32
  }
  func.func @transform_1(%arg0: i32) -> (i32, i32) {
    %c0_i32 = arith.constant 0 : i32
    %c0_i32_0 = arith.constant 0 : i32
    return %c0_i32, %arg0 : i32, i32
  }
  func.func @transform_2(%arg0: i32) -> (i32, i32) {
    %c0_i32 = arith.constant 0 : i32
    %c0_i32_0 = arith.constant 0 : i32
    %c0_i32_1 = arith.constant 0 : i32
    return %c0_i32, %c0_i32_0 : i32, i32
  }
}

</mosaic_0001>

<bundles_post_ra>
// kernel: tpu_custom_call.1
= control target key start
LH: loop header
LB: loop body
LE: loop exit
PB: predicated region body
PF: predicated region fallthrough
CT: control target
= control target key end

     0   :  { %7 = vsyncpa [#allocation5], 0  ;;  %s2973_s0 = inlined_call_operand.hbm [shape: f32[8,256], index: 0, kind: input, shape index: {}]   ;;  %s2974_s1 = inlined_call_operand.hbm [shape: f32[8,256], index: 1, kind: input, shape index: {}]   ;;  %s2975_s2 = inlined_call_operand.hbm [shape: f32[1,1], index: 2, kind: output, shape index: {}]  }
   0x1   :  { %8 = vsyncpa [#allocation8], 0 }
   0x2   :  { %9 = vsyncpa [#allocation6], 0  ;;  %s2209_s9 = smov [#allocation4]   ;;  %s2210_s11 = smov [#allocation7]  }
   0x3   :  { %s16_s10 = sshll.u32 %s2209_s9, 4  ;;  %s26_s12 = sshll.u32 %s2210_s11, 4  ;;  %s17_s10 = int_to_ptr.vmem [resolvable:$true] %s16_s10  ;;  %s27_s12 = int_to_ptr.vmem [resolvable:$true] %s26_s12 }
   0x4   :  { %s2163_s13 = scalar_lea.vmem %s17_s10, 256  ;;  %p2168_p1 = scmp.lt.s32.totalorder %s17_s10, %s17_s10 }
   0x5   :  { %p2164_p0 = scmp.ne.s32.totalorder %s17_s10, %s2163_s13  ;;  %p2169_p2 = scmp.lt.s32.totalorder %s2163_s13, %s2163_s13 }
   0x7   :  { %p2170_p3 = por %p2169_p2, %p2168_p1 }
   0x9   :  { %p2171_p4 = pnand %p2170_p3, %p2164_p0 }
   0xb   :  { %2174 = shalt.err (!%p2171_p4)
}
   0xc   :  { %19 = dma.hbm_to_vmem [thread:$0]  %s2973_s0, 256, %s17_s10, [#allocation5]  }
   0xd   :  { %s2183_s16 = scalar_lea.vmem %s27_s12, 256  ;;  %p2188_p6 = scmp.lt.s32.totalorder %s27_s12, %s27_s12 }
   0xe   :  { %p2184_p5 = scmp.ne.s32.totalorder %s27_s12, %s2183_s16  ;;  %p2189_p7 = scmp.lt.s32.totalorder %s2183_s16, %s2183_s16 }
  0x10   :  { %p2190_p8 = por %p2189_p7, %p2188_p6 }
  0x12   :  { %p2191_p9 = pnand %p2190_p8, %p2184_p5 }
  0x14   :  { %2194 = shalt.err (!%p2191_p9)
}
  0x15   :  { %29 = dma.hbm_to_vmem [thread:$0]  %s2974_s1, 256, %s27_s12, [#allocation8]  }
  0x16   :  { %2203 = dma.done.wait [#allocation5], 256  }
  0x17   :  { %2204 = vsyncadd [#allocation5], 4294967040 }
  0x18   :  { %2205 = dma.done.wait [#allocation8], 256  }
  0x19   :  { %2206 = vsyncadd [#allocation8], 4294967040  ;;  %v44_v0 = vld [vmem:[#allocation4 + $0x8] sm:$0xff]  ;;  %v43_v1 = vld [vmem:[#allocation4] sm:$0xff]  ;;  %vm40_vm0 = vcmask 64512   ;;  %v2211_v24 = vmov 0.0   ;;  %v1003_v44 = vlaneseq }
  0x1a   :  { %v46_v2 = vld [vmem:[#allocation7 + $0x8] sm:$0xff]  ;;  %v78_v3 = vand.u32 4294901760, %v44_v0  ;;  %v80_v4 = vand.u32 4294901760, %v43_v1  ;;  %v45_v5 = vld [vmem:[#allocation7] sm:$0xff]  ;;  %41 = vst.msk [vmem:[#allocation2] sm:$0xff] %vm40_vm0, %v2211_v24  ;;  %42 = vst.msk [vmem:[#allocation3] sm:$0xff] %vm40_vm0, %v2211_v24 }
  0x1b   :  { %v2242_v6 = vand.u32 4294901760, %v46_v2  ;;  %v556_v9 = vand.u32 4294901760, %v45_v5  ;;  %v2256_v51 = vshrl.u32 %v1003_v44, 7  ;;  %v2258_v52 = vand.u32 127, %v1003_v44  ;;  %s2220_s18 = smov [#allocation9]  }
  0x1c   :  { %79 = vmatprep.subr.mxu0 %v78_v3  ;;  %v115_v7 = vsub.f32 %v44_v0, %v78_v3  ;;  %v121_v8 = vsub.f32 %v43_v1, %v80_v4  ;;  %205 = vmatprep.mubr.f32.mxu1 %v78_v3 }
  0x1d   :  { %81 = vmatpush1.xpose.msra.mxu0 %v80_v4  ;;  %v591_v12 = vsub.f32 %v46_v2, %v2242_v6  ;;  %v597_v15 = vsub.f32 %v45_v5, %v556_v9  ;;  %vm1007_vm1 = vcmp.eq.s32.totalorder %v2256_v51, %v2258_v52 }
  0x1e   :  { %v116_v10 = vand.u32 4294901760, %v115_v7  ;;  %v122_v11 = vand.u32 4294901760, %v121_v8  ;;  %244 = vmatprep.subr.mxu0 %v115_v7 }
  0x1f   :  { %v592_v18 = vand.u32 4294901760, %v591_v12  ;;  %v598_v19 = vand.u32 4294901760, %v597_v15 }
  0x20   :  { %v117_v13 = vsub.f32 %v115_v7, %v116_v10  ;;  %v123_v14 = vsub.f32 %v121_v8, %v122_v11 }
  0x21   :  { %v593_v20 = vsub.f32 %v591_v12, %v592_v18  ;;  %v599_v21 = vsub.f32 %v597_v15, %v598_v19  ;;  %v47_v39 = vld [vmem:[#allocation2] sm:$0xff]  ;;  %v523_v62 = vld [vmem:[#allocation3] sm:$0xff] }
  0x22   :  { %v118_v16 = vand.u32 4294901760, %v117_v13  ;;  %v124_v17 = vand.u32 4294901760, %v123_v14 }
  0x23   :  { %v594_v22 = vand.u32 4294901760, %v593_v20  ;;  %v600_v23 = vand.u32 4294901760, %v599_v21  ;;  %v2282_v20 = vsub.s32 5, %v2256_v51  ;;  %v2285_v21 = vsub.s32 4, %v2256_v51 }
  0x24   :  { %119 = vmatprep.mubr.f32.mxu0 %v118_v16  ;;  %165 = vmatprep.subr.mxu1 %v118_v16 }
  0x25   :  { %125 = vmatmul.mubr.f32.vlgmr.msra.gmra.mxu0 %v124_v17  ;;  %171 = vmatpush1.xpose.msra.mxu1 %v124_v17 }
  0x26   :  { %247 = vmatpush1.xpose.msra.mxu0 %v121_v8  ;;  %282 = vmatprep.mubr.f32.mxu0 %v115_v7 }
  0x27   :  { %321 = vmatprep.subr.mxu1 %v78_v3  ;;  %401 = vmatprep.subr.mxu0 %v116_v10 }
  0x28   :  { %207 = vmatmul.mubr.f32.vlgmr.msra.gmra.mxu1 %v80_v4 }
  0x29   :  { %285 = vmatmul.mubr.f32.vlgmr.msra.gmra.mxu0 %v121_v8  ;;  %323 = vmatpush1.xpose.msra.mxu1 %v80_v4  ;;  %v2212_v8 = vmov 0  }
  0x2a   :  { %405 = vmatpush1.xpose.msra.mxu0 %v122_v11  ;;  %359 = vmatprep.mubr.f32.mxu1 %v116_v10 }
  0x2b   :  { %439 = vmatprep.mubr.f32.mxu0 %v78_v3  ;;  %477 = vmatprep.subr.mxu1 %v78_v3 }
  0x2c   :  { %363 = vmatmul.mubr.f32.vlgmr.msra.gmra.mxu1 %v122_v11  ;;  %555 = vmatprep.subr.mxu0 %v2242_v6 }
  0x2d   :  { %441 = vmatmul.mubr.f32.vlgmr.msra.gmra.mxu0 %v80_v4  ;;  %479 = vmatpush1.xpose.msra.mxu1 %v80_v4 }
  0x2e   :  { %513 = vmatprep.mubr.f32.mxu1 %v78_v3  ;;  %557 = vmatpush1.xpose.msra.mxu0 %v556_v9 }
  0x2f   :  { %641 = vmatprep.subr.mxu1 %v594_v22  ;;  %595 = vmatprep.mubr.f32.mxu0 %v594_v22  ;;  %v2288_v22 = vsub.s32 6, %v2256_v51 }
  0x30   :  { %515 = vmatmul.mubr.f32.vlgmr.msra.gmra.mxu1 %v80_v4  ;;  %720 = vmatprep.subr.mxu0 %v591_v12 }
  0x31   :  { %647 = vmatpush1.xpose.msra.mxu1 %v600_v23  ;;  %601 = vmatmul.mubr.f32.vlgmr.msra.gmra.mxu0 %v600_v23 }
  0x32   :  { %681 = vmatprep.mubr.f32.mxu1 %v2242_v6  ;;  %723 = vmatpush1.xpose.msra.mxu0 %v597_v15 }
  0x33   :  { %797 = vmatprep.subr.mxu1 %v2242_v6  ;;  %758 = vmatprep.mubr.f32.mxu0 %v591_v12 }
  0x34   :  { %683 = vmatmul.mubr.f32.vlgmr.msra.gmra.mxu1 %v556_v9  ;;  %877 = vmatprep.subr.mxu0 %v592_v18 }
  0x35   :  { %799 = vmatpush1.xpose.msra.mxu1 %v556_v9  ;;  %761 = vmatmul.mubr.f32.vlgmr.msra.gmra.mxu0 %v597_v15 }
  0x36   :  { %835 = vmatprep.mubr.f32.mxu1 %v592_v18  ;;  %881 = vmatpush1.xpose.msra.mxu0 %v598_v19 }
  0x37   :  { %953 = vmatprep.subr.mxu1 %v2242_v6  ;;  %915 = vmatprep.mubr.f32.mxu0 %v2242_v6 }
  0x38   :  { %839 = vmatmul.mubr.f32.vlgmr.msra.gmra.mxu1 %v598_v19  ;;  %2042 = vset.pattern.permute.xlu1 %v2212_v8 }
  0x39   :  { %955 = vmatpush1.xpose.msra.mxu1 %v556_v9  ;;  %917 = vmatmul.mubr.f32.vlgmr.msra.gmra.mxu0 %v556_v9 }
  0x3a   :  { %989 = vmatprep.mubr.f32.mxu1 %v2242_v6 }
  0x3c   :  { %991 = vmatmul.mubr.f32.vlgmr.msra.gmra.mxu1 %v556_v9  ;;  %v2980_v9 = vmov 1  }
  0x3d   :  { %2043 = vset.pattern.permute.xlu0 %v2980_v9 }
  0xe5   :  { %v126_v25 = vpop.f32.mrf.mxu0 }
  0xe7   :  { %v128_v26 = vpop.f32.mrf.mxu0 }
  0xe8   :  { %v208_v27 = vpop.f32.mrf.mxu1 }
  0xe9   :  { %v209_v28 = vadd.f32 %v208_v27, %v126_v25  ;;  %v286_v29 = vpop.f32.mrf.mxu0 }
  0xea   :  { %v210_v30 = vpop.f32.mrf.mxu1 }
  0xeb   :  { %v287_v31 = vadd.f32 %v286_v29, %v209_v28  ;;  %v288_v32 = vpop.f32.mrf.mxu0 }
  0xec   :  { %v364_v33 = vpop.f32.mrf.mxu1 }
  0xed   :  { %v365_v34 = vadd.f32 %v364_v33, %v287_v31  ;;  %v442_v35 = vpop.f32.mrf.mxu0 }
  0xee   :  { %v366_v36 = vpop.f32.mrf.mxu1 }
  0xef   :  { %v443_v37 = vadd.f32 %v442_v35, %v365_v34  ;;  %v444_v38 = vpop.f32.mrf.mxu0 }
  0xf0   :  { %v516_v40 = vpop.f32.mrf.mxu1 }
  0xf1   :  { %v517_v41 = vadd.f32 %v516_v40, %v443_v37  ;;  %v602_v42 = vpop.f32.mrf.mxu0 }
  0xf2   :  { %v518_v43 = vpop.f32.mrf.mxu1 }
  0xf3   :  { %v520_v45 = vadd.f32 %v517_v41, %v47_v39  ;;  %v604_v46 = vpop.f32.mrf.mxu0 }
  0xf4   :  { %v684_v47 = vpop.f32.mrf.mxu1 }
  0xf5   :  { %522 = vst.msk [vmem:[#allocation2] sm:$0xff] %vm40_vm0, %v520_v45  ;;  %v685_v48 = vadd.f32 %v684_v47, %v602_v42  ;;  %v762_v49 = vpop.f32.mrf.mxu0 }
  0xf6   :  { %v686_v50 = vpop.f32.mrf.mxu1 }
  0xf7   :  { %v763_v53 = vadd.f32 %v762_v49, %v685_v48  ;;  %v764_v54 = vpop.f32.mrf.mxu0 }
  0xf8   :  { %v840_v55 = vpop.f32.mrf.mxu1 }
  0xf9   :  { %v841_v56 = vadd.f32 %v840_v55, %v763_v53  ;;  %v918_v57 = vpop.f32.mrf.mxu0 }
  0xfa   :  { %v842_v58 = vpop.f32.mrf.mxu1 }
  0xfb   :  { %v919_v59 = vadd.f32 %v918_v57, %v841_v56  ;;  %v920_v60 = vpop.f32.mrf.mxu0 }
  0xfc   :  { %v2262_v61 = vld [vmem:[#allocation2] sm:$0xff]  ;;  %v992_v63 = vpop.f32.mrf.mxu1 }
  0xfd   :  { %v993_v0 = vadd.f32 %v992_v63, %v919_v59  ;;  %v1008_v1 = vsel %vm1007_vm1, %v2262_v61, 0.0  ;;  %v2291_v23 = vmul.f32 2.0, %v2262_v61  ;;  %v2349_v63 = vsub.s32 0, %v2256_v51 }
  0xfe   :  { %v1009_v2 = vsel %vm40_vm0, %v1008_v1, 0.0  ;;  %v994_v3 = vpop.f32.mrf.mxu1  ;;  %v2357_v1 = vsub.s32 2, %v2256_v51 }
  0xff   :  { %v996_v4 = vadd.f32 %v993_v0, %v523_v62  ;;  %1010 = vadd.xlane.f32.xlu0 %v1009_v2  ;;  %v1012_v10 = vrot.slane %v1009_v2, 4 }
 0x101   :  { %997 = vst.msk [vmem:[#allocation3] sm:$0xff] %vm40_vm0, %v996_v4  ;;  %v1013_v11 = vadd.f32 %v1012_v10, %v1009_v2 }
 0x103   :  { %v1014_v12 = vrot.slane %v1013_v11, 2 }
 0x105   :  { %v1015_v13 = vadd.f32 %v1014_v12, %v1013_v11  ;;  %v2375_v11 = vsub.s32 1, %v2256_v51  ;;  %v2378_v12 = vsub.s32 3, %v2256_v51 }
 0x107   :  { %v1016_v15 = vrot.slane %v1015_v13, 1 }
 0x108   :  { %v2270_v5 = vld [vmem:[#allocation3] sm:$0xff] }
 0x109   :  { %v1061_v6 = vsel %vm1007_vm1, %v2270_v5, 0.0  ;;  %v1017_v17 = vadd.f32 %v1016_v15, %v1015_v13  ;;  %v2332_v42 = vmul.f32 2.0, %v2270_v5 }
 0x10a   :  { %v1062_v7 = vsel %vm40_vm0, %v1061_v6, 0.0  ;;  %v2370_v6 = vsub.s32 7, %v2256_v51 }
 0x10b   :  { %1063 = vadd.xlane.f32.xlu0 %v1062_v7  ;;  %v1065_v14 = vrot.slane %v1062_v7, 4 }
 0x10c   :  { %2994 = vst [vmem:[#allocation15_spill] sm:$0xff] %v2370_v6 }
 0x10d   :  { %v1066_v16 = vadd.f32 %v1065_v14, %v1062_v7 }
 0x10f   :  { %v1067_v18 = vrot.slane %v1066_v16, 2 }
 0x111   :  { %v1068_v29 = vadd.f32 %v1067_v18, %v1066_v16 }
 0x113   :  { %v1069_v37 = vrot.slane %v1068_v29, 1 }
 0x115   :  { %v1070_v39 = vadd.f32 %v1069_v37, %v1068_v29 }
 0x188   :  { %v2279_v19 = vpop.xlane.xlu0 %1010 }
 0x189   :  { %v1018_v25 = vadd.f32 %v1017_v17, %v2279_v19  ;;  %v2296_v26 = vrot.slane %v2279_v19, %v2282_v20  ;;  %v2300_v27 = vrot.slane %v2279_v19, %v2285_v21  ;;  %v2304_v28 = vrot.slane %v2279_v19, %v2288_v22 }
 0x18a   :  { %v2362_v2 = vrot.slane %v2279_v19, %v2349_v63  ;;  %v2367_v4 = vrot.slane %v2279_v19, %v2357_v1  ;;  %v2389_v15 = vrot.slane %v2279_v19, %v2375_v11  ;;  %v2395_v17 = vrot.slane %v2279_v19, %v2378_v12 }
 0x18b   :  { %v2307_v30 = vsub.f32 %v1018_v25, %v2291_v23  ;;  %v2311_v31 = vadd.f32 %v2296_v26, %v2279_v19  ;;  %v2315_v32 = vadd.f32 %v2300_v27, %v2279_v19  ;;  %v2324_v36 = vadd.f32 %v2304_v28, %v2279_v19 }
 0x18c   :  { %v1138_v14 = vadd.f32 %v2362_v2, %v2279_v19  ;;  %v1364_v16 = vadd.f32 %v2367_v4, %v2279_v19  ;;  %v1263_v29 = vadd.f32 %v2389_v15, %v2279_v19  ;;  %v1465_v37 = vadd.f32 %v2395_v17, %v2279_v19 }
 0x18d   :  { %v1021_v33 = vmax.f32 %v2307_v30, 1e-12  ;;  %v1668_v34 = vsub.f32 %v2311_v31, %v2291_v23  ;;  %v1567_v35 = vsub.f32 %v2315_v32, %v2291_v23  ;;  %v1769_v38 = vsub.f32 %v2324_v36, %v2291_v23 }
 0x18e   :  { %v1139_v25 = vsub.f32 %v1138_v14, %v2291_v23 }
 0x18f   :  { %2069 = vrsqrt.f32 %v1021_v33  ;;  %vm1024_vm2 = vcmp.eq.f32.partialorder %v1021_v33, inf  ;;  %v1027_v47 = vand.u32 2147483648, %v1021_v33  ;;  %vm1026_vm3 = vcmp.eq.f32.partialorder %v1021_v33, 0.0 }
 0x194   :  { %v2328_v40 = vpop.xlane.xlu0 %1063 }
 0x195   :  { %v1071_v41 = vadd.f32 %v1070_v39, %v2328_v40 }
 0x197   :  { %v2335_v43 = vsub.f32 %v1071_v41, %v2332_v42  ;;  %v2409_v41 = vmax.f32 %v1139_v25, 0.0 }
 0x199   :  { %v1074_v44 = vmax.f32 %v2335_v43, 1e-12  ;;  %vm1144_vm8 = vcmp.eq.f32.partialorder %v2409_v41, inf  ;;  %vm1146_vm10 = vcmp.eq.f32.partialorder %v2409_v41, 0.0 }
 0x19b   :  { %2071 = vrsqrt.f32 %v1074_v44  ;;  %vm1077_vm5 = vcmp.eq.f32.partialorder %v1074_v44, inf  ;;  %v1080_v58 = vand.u32 2147483648, %v1074_v44  ;;  %vm1079_vm6 = vcmp.eq.f32.partialorder %v1074_v44, 0.0 }
 0x19c   :  { %v2070_v45 = vpop.eup %2069  ;;  %2073 = vrsqrt.f32 %v2409_v41 }
 0x19d   :  { %v1023_v46 = vmul.f32 %v2070_v45, %v1021_v33 }
 0x19f   :  { %v1025_v48 = vsel %vm1024_vm2, %v1021_v33, %v1023_v46  ;;  %v1365_v33 = vsub.f32 %v1364_v16, %v2291_v23  ;;  %v1466_v46 = vsub.f32 %v1465_v37, %v2291_v23 }
 0x1a0   :  { %v1028_v49 = vsel %vm1026_vm3, %v1027_v47, %v1025_v48  ;;  %v2417_v47 = vrot.slane %v2328_v40, %v2285_v21 }
 0x1a1   :  { %v2341_v50 = vsel %vm1007_vm1, 0.0, %v1028_v49  ;;  %v2412_v45 = vmax.f32 %v1365_v33, 0.0  ;;  %v2976_v33 = vmov 3  }
 0x1a2   :  { %2992 = vst [vmem:[#allocation13_spill] sm:$0xff] %v2341_v50  ;;  %vm1030_vm4 = vcmp.gt.f32.partialorder %v2341_v50, 0.0  ;;  %v1609_v49 = vadd.f32 %v2417_v47, %v2328_v40 }
 0x1a3   :  { %v1989_v53 = vsel %vm1030_vm4, 1.0, %v2211_v24  ;;  %2075 = vrsqrt.f32 %v2412_v45  ;;  %vm1369_vm9 = vcmp.eq.f32.partialorder %v2412_v45, inf  ;;  %vm1371_vm11 = vcmp.eq.f32.partialorder %v2412_v45, 0.0 }
 0x1a4   :  { %v1033_v54 = vmul.f32 %v1989_v53, %v2341_v50  ;;  %v1044_v59 = vsel %vm40_vm0, %v1989_v53, 0.0  ;;  %v2431_v53 = vrot.slane %v2328_v40, %v2288_v22 }
 0x1a6   :  { %v1034_v55 = vsel %vm40_vm0, %v1033_v54, 0.0  ;;  %v2437_v54 = vmax.f32 %v1668_v34, 0.0  ;;  %v2461_v34 = vrot.slane %v2328_v40, %v2375_v11 }
 0x1a7   :  { %1035 = vadd.xlane.f32.xlu1 %v1034_v55  ;;  %v2442_v55 = vmax.f32 %v1567_v35, 0.0  ;;  %v2982_v35 = vmov 2  }
 0x1a8   :  { %v2072_v56 = vpop.eup %2071  ;;  %vm1674_vm2 = vcmp.eq.f32.partialorder %v2437_v54, 0.0 }
 0x1a9   :  { %v1076_v57 = vmul.f32 %v2072_v56, %v1074_v44  ;;  %v2446_v56 = vrot.slane %v2328_v40, %v2349_v63  ;;  %vm1571_vm3 = vcmp.eq.f32.partialorder %v2442_v55, inf  ;;  %vm1573_vm4 = vcmp.eq.f32.partialorder %v2442_v55, 0.0 }
 0x1ab   :  { %v1078_v60 = vsel %vm1077_vm5, %v1074_v44, %v1076_v57  ;;  %1045 = vadd.xlane.f32.xlu1 %v1044_v59  ;;  %v1264_v44 = vsub.f32 %v1263_v29, %v2291_v23  ;;  %v1610_v57 = vsub.f32 %v1609_v49, %v2332_v42  ;;  %v1193_v31 = vadd.f32 %v2446_v56, %v2328_v40 }
 0x1ac   :  { %v1081_v62 = vsel %vm1079_vm6, %v1080_v58, %v1078_v60  ;;  %v1811_v58 = vadd.f32 %v2431_v53, %v2328_v40  ;;  %v2467_v59 = vmax.f32 %v1769_v38, 0.0  ;;  %v2482_v38 = vrot.slane %v2328_v40, %v2357_v1 }
 0x1ad   :  { %v2354_v0 = vsel %vm1007_vm1, 0.0, %v1081_v62  ;;  %v2420_v48 = vmax.f32 %v1264_v44, 0.0  ;;  %v2457_v32 = vmax.f32 %v1610_v57, 0.0  ;;  %v2074_v62 = vpop.eup %2073  ;;  %v1147_v57 = vand.u32 2147483648, %v2409_v41 }
 0x1ae   :  { %2993 = vst [vmem:[#allocation14_spill] sm:$0xff] %v2354_v0  ;;  %vm1083_vm7 = vcmp.gt.f32.partialorder %v2354_v0, 0.0  ;;  %v1812_v60 = vsub.f32 %v1811_v58, %v2332_v42  ;;  %v1407_v49 = vadd.f32 %v2482_v38, %v2328_v40  ;;  %vm1672_vm1 = vcmp.eq.f32.partialorder %v2437_v54, inf }
 0x1af   :  { %v1990_v3 = vsel %vm1083_vm7, 1.0, %v2211_v24  ;;  %v2382_v24 = vrot.slane %v2279_v19, %v2370_v6  ;;  %2077 = vrsqrt.f32 %v2420_v48  ;;  %vm1268_vm12 = vcmp.eq.f32.partialorder %v2420_v48, inf }
 0x1b0   :  { %v1097_v7 = vsel %vm40_vm0, %v1990_v3, 0.0  ;;  %v1086_v10 = vmul.f32 %v1990_v3, %v2354_v0  ;;  %v2076_v3 = vpop.eup %2075  ;;  %v2478_v36 = vmax.f32 %v1812_v60, 0.0  ;;  %v2504_v60 = vrot.slane %v2328_v40, %v2378_v12 }
 0x1b1   :  { %1098 = vadd.xlane.f32.xlu1 %v1097_v7  ;;  %2995 = vst [vmem:[#allocation16_spill] sm:$0xff] %v2382_v24  ;;  %v2399_v18 = vadd.f32 %v2382_v24, %v2279_v19  ;;  %v2423_v19 = vmax.f32 %v1466_v46, 0.0  ;;  %v1194_v7 = vsub.f32 %v1193_v31, %v2332_v42  ;;  %v1368_v16 = vmul.f32 %v2076_v3, %v2412_v45 }
 0x1b2   :  { %v1087_v13 = vsel %vm40_vm0, %v1086_v10, 0.0  ;;  %v1306_v10 = vadd.f32 %v2461_v34, %v2328_v40  ;;  %2996 = vst [vmem:[#allocation17_spill] sm:$0xff] %v2504_v60  ;;  %v1372_v3 = vand.u32 2147483648, %v2412_v45  ;;  %vm1270_vm13 = vcmp.eq.f32.partialorder %v2420_v48, 0.0 }
 0x1b3   :  { %1088 = vadd.xlane.f32.xlu0 %v1087_v13  ;;  %v1870_v39 = vsub.f32 %v2399_v18, %v2291_v23  ;;  %2079 = vrsqrt.f32 %v2423_v19  ;;  %v1143_v13 = vmul.f32 %v2074_v62, %v2409_v41  ;;  %v2486_v29 = vmax.f32 %v1194_v7, 0.0 }
 0x1b4   :  { %2081 = vrsqrt.f32 %v2437_v54  ;;  %v1307_v37 = vsub.f32 %v1306_v10, %v2332_v42  ;;  %v1370_v58 = vsel %vm1369_vm9, %v2412_v45, %v1368_v16  ;;  %vm1470_vm14 = vcmp.eq.f32.partialorder %v2423_v19, inf }
 0x1b5   :  { %2083 = vrsqrt.f32 %v2442_v55  ;;  %v1145_v44 = vsel %vm1144_vm8, %v2409_v41, %v1143_v13  ;;  %v1373_v16 = vsel %vm1371_vm11, %v1372_v3, %v1370_v58  ;;  %v1408_v45 = vsub.f32 %v1407_v49, %v2332_v42 }
 0x1b6   :  { %2085 = vrsqrt.f32 %v2457_v32  ;;  %v1148_v10 = vsel %vm1146_vm10, %v1147_v57, %v1145_v44  ;;  %v2513_v13 = vmax.f32 %v1307_v37, 0.0  ;;  %v1508_v37 = vadd.f32 %v2504_v60, %v2328_v40 }
 0x1b7   :  { %2087 = vrsqrt.f32 %v2467_v59  ;;  %v1149_v58 = vmax.f32 %v1148_v10, 1e-12  ;;  %v2530_v49 = vrot.slane %v2328_v40, %v2282_v20  ;;  %vm1472_vm15 = vcmp.eq.f32.partialorder %v2423_v19, 0.0 }
 0x1b8   :  { %2089 = vrsqrt.f32 %v2478_v36  ;;  %vm1614_vm5 = vcmp.eq.f32.partialorder %v2457_v32, inf  ;;  %vm1773_vm6 = vcmp.eq.f32.partialorder %v2467_v59, inf  ;;  %vm1616_vm7 = vcmp.eq.f32.partialorder %v2457_v32, 0.0 }
 0x1b9   :  { %2091 = vrsqrt.f32 %v2486_v29  ;;  %2997 = vst [vmem:[#allocation18_spill] sm:$0xff] %v2530_v49  ;;  %vm1775_vm8 = vcmp.eq.f32.partialorder %v2467_v59, 0.0  ;;  %vm1816_vm9 = vcmp.eq.f32.partialorder %v2478_v36, inf  ;;  %vm1818_vm10 = vcmp.eq.f32.partialorder %v2478_v36, 0.0 }
 0x1ba   :  { %2093 = vrsqrt.f32 %v2513_v13  ;;  %vm1199_vm11 = vcmp.eq.f32.partialorder %v2486_v29, inf }
 0x1bb   :  { %2095 = vrcp.f32 %v1149_v58 }
 0x1bc   :  { %v2078_v14 = vpop.eup %2077 }
 0x1bd   :  { %v1267_v46 = vmul.f32 %v2078_v14, %v2420_v48  ;;  %v2978_v14 = vmov 4  }
 0x1bf   :  { %v1269_v41 = vsel %vm1268_vm12, %v2420_v48, %v1267_v46  ;;  %v1473_v46 = vand.u32 2147483648, %v2423_v19  ;;  %vm1201_vm12 = vcmp.eq.f32.partialorder %v2486_v29, 0.0 }
 0x1c0   :  { %v2080_v25 = vpop.eup %2079 }
 0x1c1   :  { %v1469_v31 = vmul.f32 %v2080_v25, %v2423_v19  ;;  %v2082_v62 = vpop.eup %2081  ;;  %v1271_v25 = vand.u32 2147483648, %v2420_v48  ;;  %v1675_v48 = vand.u32 2147483648, %v2437_v54 }
 0x1c2   :  { %1164 = vperm.xlu1 %2042, %v2262_v61   ;;  %v2084_v7 = vpop.eup %2083  ;;  %v1671_v57 = vmul.f32 %v2082_v62, %v2437_v54 }
 0x1c3   :  { %v1471_v44 = vsel %vm1470_vm14, %v2423_v19, %v1469_v31  ;;  %v1570_v3 = vmul.f32 %v2084_v7, %v2442_v55  ;;  %v1374_v31 = vmax.f32 %v1373_v16, 1e-12  ;;  %v1272_v62 = vsel %vm1270_vm13, %v1271_v25, %v1269_v41 }
 0x1c4   :  { %v1474_v10 = vsel %vm1472_vm15, %v1473_v46, %v1471_v44  ;;  %v2539_v7 = vmax.f32 %v1408_v45, 0.0  ;;  %v1673_v16 = vsel %vm1672_vm1, %v2437_v54, %v1671_v57  ;;  %v1509_v19 = vsub.f32 %v1508_v37, %v2332_v42 }
 0x1c5   :  { %v1273_v41 = vmax.f32 %v1272_v62, 1e-12  ;;  %v1572_v25 = vsel %vm1571_vm3, %v2442_v55, %v1570_v3  ;;  %v1710_v44 = vadd.f32 %v2530_v49, %v2328_v40  ;;  %v2218_v45 = vmov 6  }
 0x1c6   :  { %1219 = vperm.xlu1 %2042, %v2270_v5   ;;  %2097 = vrcp.f32 %v1374_v31  ;;  %v1475_v46 = vmax.f32 %v1474_v10, 1e-12  ;;  %v1574_v57 = vand.u32 2147483648, %v2442_v55  ;;  %v1676_v37 = vsel %vm1674_vm2, %v1675_v48, %v1673_v16 }
 0x1c7   :  { %2099 = vrsqrt.f32 %v2539_v7  ;;  %v2559_v62 = vmax.f32 %v1509_v19, 0.0  ;;  %v1711_v54 = vsub.f32 %v1710_v44, %v2332_v42  ;;  %v2568_v10 = vrot.slane %v2328_v40, %v2370_v6 }
 0x1c8   :  { %v1575_v31 = vsel %vm1573_vm4, %v1574_v57, %v1572_v25  ;;  %2101 = vrcp.f32 %v1273_v41  ;;  %v2219_v16 = vmov 7   ;;  %v1617_v19 = vand.u32 2147483648, %v2457_v32 }
 0x1c9   :  { %1277 = vperm.xlu0 %2043, %v2262_v61   ;;  %2103 = vrcp.f32 %v1475_v46  ;;  %2998 = vst [vmem:[#allocation19_spill] sm:$0xff] %v2568_v10  ;;  %v1576_v48 = vmax.f32 %v1575_v31, 1e-12  ;;  %v2581_v57 = vmax.f32 %v1711_v54, 0.0  ;;  %v1819_v31 = vand.u32 2147483648, %v2478_v36 }
 0x1ca   :  { %2044 = vset.pattern.permute.xlu1 %v2982_v35  ;;  %2105 = vrsqrt.f32 %v2559_v62  ;;  %vm1311_vm13 = vcmp.eq.f32.partialorder %v2513_v13, inf  ;;  %vm1313_vm14 = vcmp.eq.f32.partialorder %v2513_v13, 0.0  ;;  %vm1412_vm15 = vcmp.eq.f32.partialorder %v2539_v7, inf }
 0x1cb   :  { %1378 = vperm.xlu1 %2044, %v2262_v61   ;;  %vm1414_vm1 = vcmp.eq.f32.partialorder %v2539_v7, 0.0  ;;  %vm1513_vm2 = vcmp.eq.f32.partialorder %v2559_v62, inf  ;;  %vm1515_vm3 = vcmp.eq.f32.partialorder %v2559_v62, 0.0  ;;  %vm1715_vm4 = vcmp.eq.f32.partialorder %v2581_v57, inf }
 0x1cd   :  { %1320 = vperm.xlu0 %2043, %v2270_v5  }
 0x1cf   :  { %1421 = vperm.xlu1 %2044, %v2270_v5  }
 0x1d1   :  { %2045 = vset.pattern.permute.xlu0 %v2976_v33 }
 0x1d2   :  { %1479 = vperm.xlu0 %2045, %v2262_v61  }
 0x1d3   :  { %2046 = vset.pattern.permute.xlu1 %v2976_v33  ;;  %v2217_v33 = vmov 5  }
 0x1d4   :  { %1522 = vperm.xlu1 %2046, %v2270_v5  }
 0x1d6   :  { %2047 = vset.pattern.permute.xlu0 %v2978_v14  ;;  %v2086_v14 = vpop.eup %2085 }
 0x1d7   :  { %1580 = vperm.xlu0 %2047, %v2262_v61   ;;  %v2088_v9 = vpop.eup %2087  ;;  %v1613_v35 = vmul.f32 %v2086_v14, %v2457_v32 }
 0x1d8   :  { %2048 = vset.pattern.permute.xlu1 %v2217_v33  ;;  %v1772_v58 = vmul.f32 %v2088_v9, %v2467_v59  ;;  %v2090_v3 = vpop.eup %2089  ;;  %v1677_v9 = vmax.f32 %v1676_v37, 1e-12 }
 0x1d9   :  { %1681 = vperm.xlu1 %2048, %v2262_v61   ;;  %v2092_v55 = vpop.eup %2091  ;;  %v1615_v14 = vsel %vm1614_vm5, %v2457_v32, %v1613_v35  ;;  %v1815_v25 = vmul.f32 %v2090_v3, %v2478_v36  ;;  %v1776_v35 = vand.u32 2147483648, %v2467_v59  ;;  %v1912_v32 = vadd.f32 %v2568_v10, %v2328_v40 }
 0x1da   :  { %v1774_v41 = vsel %vm1773_vm6, %v2467_v59, %v1772_v58  ;;  %v1618_v44 = vsel %vm1616_vm7, %v1617_v19, %v1615_v14  ;;  %v1198_v46 = vmul.f32 %v2092_v55, %v2486_v29  ;;  %2107 = vrcp.f32 %v1677_v9  ;;  %v2094_v58 = vpop.eup %2093 }
 0x1db   :  { %1623 = vperm.xlu0 %2047, %v2270_v5   ;;  %v1777_v37 = vsel %vm1775_vm8, %v1776_v35, %v1774_v41  ;;  %2109 = vrcp.f32 %v1576_v48  ;;  %v1817_v3 = vsel %vm1816_vm9, %v2478_v36, %v1815_v25  ;;  %v1619_v59 = vmax.f32 %v1618_v44, 1e-12  ;;  %v2096_v40 = vpop.eup %2095 }
 0x1dc   :  { %v1778_v54 = vmax.f32 %v1777_v37, 1e-12  ;;  %v1200_v55 = vsel %vm1199_vm11, %v2486_v29, %v1198_v46  ;;  %v1202_v9 = vand.u32 2147483648, %v2486_v29  ;;  %2111 = vrsqrt.f32 %v2581_v57  ;;  %v2098_v41 = vpop.eup %2097 }
 0x1dd   :  { %2051 = vset.pattern.permute.xlu1 %v2218_v45  ;;  %v1820_v14 = vsel %vm1818_vm10, %v1819_v31, %v1817_v3  ;;  %v1310_v48 = vmul.f32 %v2094_v58, %v2513_v13  ;;  %v2600_v19 = vmax.f32 %v1870_v39, 0.0  ;;  %v1913_v36 = vsub.f32 %v1912_v32, %v2332_v42  ;;  %v2100_v25 = vpop.eup %2099 }
 0x1de   :  { %1825 = vperm.xlu1 %2051, %v2270_v5   ;;  %v2999_v35 = vmov 2   ;;  %2113 = vrcp.f32 %v1619_v59  ;;  %v1203_v44 = vsel %vm1201_vm12, %v1202_v9, %v1200_v55  ;;  %v1821_v46 = vmax.f32 %v1820_v14, 1e-12  ;;  %v2102_v37 = vpop.eup %2101 }
 0x1df   :  { %2049 = vset.pattern.permute.xlu0 %v2217_v33  ;;  %2115 = vrcp.f32 %v1778_v54  ;;  %v1312_v23 = vsel %vm1311_vm13, %v2513_v13, %v1310_v48  ;;  %v2608_v42 = vmax.f32 %v1913_v36, 0.0  ;;  %v2104_v18 = vpop.eup %2103  ;;  %v3000_v39 = vmov 1  }
 0x1e0   :  { %1724 = vperm.xlu0 %2049, %v2270_v5   ;;  %2117 = vrsqrt.f32 %v2600_v19  ;;  %v1204_v29 = vmax.f32 %v1203_v44, 1e-12  ;;  %v1314_v32 = vand.u32 2147483648, %v2513_v13  ;;  %v1411_v58 = vmul.f32 %v2100_v25, %v2539_v7  ;;  %v2106_v3 = vpop.eup %2105 }
 0x1e1   :  { %v3001_v59 = vmov 3   ;;  %2119 = vrcp.f32 %v1821_v46  ;;  %v1415_v13 = vand.u32 2147483648, %v2539_v7  ;;  %v1512_v14 = vmul.f32 %v2106_v3, %v2559_v62 }
 0x1e2   :  { %2052 = vset.pattern.permute.xlu1 %v2219_v16  ;;  %v1315_v31 = vsel %vm1313_vm14, %v1314_v32, %v1312_v23  ;;  %2121 = vrsqrt.f32 %v2608_v42  ;;  %v1413_v55 = vsel %vm1412_vm15, %v2539_v7, %v1411_v58  ;;  %v3002_v36 = vmov 4  }
 0x1e3   :  { %1883 = vperm.xlu1 %2052, %v2262_v61   ;;  %2123 = vrcp.f32 %v1204_v29  ;;  %v1514_v25 = vsel %vm1513_vm2, %v2559_v62, %v1512_v14  ;;  %vm1717_vm5 = vcmp.eq.f32.partialorder %v2581_v57, 0.0  ;;  %vm1874_vm6 = vcmp.eq.f32.partialorder %v2600_v19, inf }
 0x1e4   :  { %2050 = vset.pattern.permute.xlu0 %v2218_v45  ;;  %v1877_v14 = vand.u32 2147483648, %v2600_v19  ;;  %vm1876_vm7 = vcmp.eq.f32.partialorder %v2600_v19, 0.0  ;;  %vm1917_vm8 = vcmp.eq.f32.partialorder %v2608_v42, inf  ;;  %vm1919_vm9 = vcmp.eq.f32.partialorder %v2608_v42, 0.0 }
 0x1e5   :  { %1782 = vperm.xlu0 %2050, %v2262_v61   ;;  %vm1185_vm14 = vcmp.ne.s32.totalorder %v2256_v51, 0  ;;  %vm1186_vm15 = vcmp.ne.s32.totalorder %v2258_v52, 0  ;;  %vm1602_vm2 = vcmp.ne.s32.totalorder %v2258_v52, 4 }
 0x1e7   :  { %1926 = vperm.xlu1 %2052, %v2270_v5   ;;  %v2108_v54 = vpop.eup %2107 }
 0x1e8   :  { %v2110_v9 = vpop.eup %2109 }
 0x1e9   :  { %2053 = vset.pattern.permute.xlu0 %v2212_v8  ;;  %v2112_v48 = vpop.eup %2111 }
 0x1ea   :  { %1176 = vperm.xlu0 %2053, %v2096_v40   ;;  %v1316_v40 = vmax.f32 %v1315_v31, 1e-12  ;;  %v1714_v23 = vmul.f32 %v2112_v48, %v2581_v57  ;;  %v1718_v31 = vand.u32 2147483648, %v2581_v57 }
 0x1eb   :  { %2055 = vset.pattern.permute.xlu1 %v2999_v35  ;;  %v2114_v44 = vpop.eup %2113 }
 0x1ec   :  { %1390 = vperm.xlu1 %2055, %v2098_v41   ;;  %v1416_v41 = vsel %vm1414_vm1, %v1415_v13, %v1413_v55  ;;  %2125 = vrcp.f32 %v1316_v40  ;;  %v1716_v32 = vsel %vm1715_vm4, %v2581_v57, %v1714_v23  ;;  %vm1601_vm1 = vcmp.ne.s32.totalorder %v2256_v51, 4 }
 0x1ed   :  { %v1417_v46 = vmax.f32 %v1416_v41, 1e-12  ;;  %vm1803_vm4 = vcmp.ne.s32.totalorder %v2256_v51, 6 }
 0x1ee   :  { %2054 = vset.pattern.permute.xlu0 %v3000_v39 }
 0x1ef   :  { %1289 = vperm.xlu0 %2054, %v2102_v37   ;;  %v1516_v37 = vand.u32 2147483648, %v2559_v62  ;;  %2127 = vrcp.f32 %v1417_v46 }
 0x1f0   :  { %2056 = vset.pattern.permute.xlu1 %v3001_v59 }
 0x1f1   :  { %1491 = vperm.xlu1 %2056, %v2104_v18   ;;  %v2116_v18 = vpop.eup %2115  ;;  %v1517_v29 = vsel %vm1515_vm3, %v1516_v37, %v1514_v25  ;;  %vm2778_vm3 = vmand %vm1601_vm1, %vm1602_vm2  ;;  %vm1501_vm1 = vcmp.ne.s32.totalorder %v2258_v52, 3 }
 0x1f2   :  { %v2118_v7 = vpop.eup %2117  ;;  %v1518_v3 = vmax.f32 %v1517_v29, 1e-12 }
 0x1f3   :  { %2058 = vset.pattern.permute.xlu0 %v2217_v33  ;;  %v2120_v58 = vpop.eup %2119 }
 0x1f4   :  { %1693 = vperm.xlu0 %2058, %v2108_v54   ;;  %v1873_v54 = vmul.f32 %v2118_v7, %v2600_v19  ;;  %v2122_v55 = vpop.eup %2121  ;;  %2129 = vrcp.f32 %v1518_v3 }
 0x1f5   :  { %2057 = vset.pattern.permute.xlu1 %v3002_v36  ;;  %v2124_v62 = vpop.eup %2123 }
 0x1f6   :  { %1592 = vperm.xlu1 %2057, %v2110_v9   ;;  %v1719_v9 = vsel %vm1717_vm5, %v1718_v31, %v1716_v32  ;;  %v1875_v40 = vsel %vm1874_vm6, %v2600_v19, %v1873_v54  ;;  %vm1804_vm5 = vcmp.ne.s32.totalorder %v2258_v52, 6 }
 0x1f7   :  { %v1720_v13 = vmax.f32 %v1719_v9, 1e-12  ;;  %vm2812_vm6 = vmand %vm1803_vm4, %vm1804_vm5  ;;  %vm1702_vm4 = vcmp.ne.s32.totalorder %v2256_v51, 5  ;;  %vm1703_vm5 = vcmp.ne.s32.totalorder %v2258_v52, 5 }
 0x1f8   :  { %2064 = vset.pattern.permute.xlu0 %v3002_v36  ;;  %v1920_v36 = vand.u32 2147483648, %v2608_v42 }
 0x1f9   :  { %1635 = vperm.xlu0 %2064, %v2114_v44   ;;  %v2126_v57 = vpop.eup %2125  ;;  %2131 = vrcp.f32 %v1720_v13 }
 0x1fa   :  { %2059 = vset.pattern.permute.xlu1 %v2218_v45 }
 0x1fb   :  { %1794 = vperm.xlu1 %2059, %v2116_v18  }
 0x1fc   :  { %v2128_v44 = vpop.eup %2127 }
 0x1fd   :  { %2066 = vset.pattern.permute.xlu0 %v2218_v45  ;;  %v1916_v45 = vmul.f32 %v2122_v55, %v2608_v42 }
 0x1fe   :  { %1837 = vperm.xlu0 %2066, %v2120_v58  }
 0x1ff   :  { %2060 = vset.pattern.permute.xlu1 %v2212_v8  ;;  %v1878_v8 = vsel %vm1876_vm7, %v1877_v14, %v1875_v40  ;;  %v1918_v48 = vsel %vm1917_vm8, %v2608_v42, %v1916_v45  ;;  %v1196_v40 = vmax.f32 %v2335_v43, 0.0  ;;  %vm2826_vm7 = vmand %vm1185_vm14, %vm1186_vm15  ;;  %vm1298_vm8 = vcmp.ne.s32.totalorder %v2256_v51, 1 }
 0x200   :  { %1231 = vperm.xlu1 %2060, %v2124_v62   ;;  %v1879_v41 = vmax.f32 %v1878_v8, 1e-12  ;;  %v1921_v25 = vsel %vm1919_vm9, %v1920_v36, %v1918_v48  ;;  %vm1299_vm9 = vcmp.ne.s32.totalorder %v2258_v52, 1  ;;  %vm1500_vm15 = vcmp.ne.s32.totalorder %v2256_v51, 3 }
 0x201   :  { %v1922_v19 = vmax.f32 %v1921_v25, 1e-12  ;;  %vm1209_vm12 = vcmp.eq.f32.partialorder %v1196_v40, inf  ;;  %vm1211_vm13 = vcmp.eq.f32.partialorder %v1196_v40, 0.0 }
 0x202   :  { %2068 = vset.pattern.permute.xlu0 %v2219_v16  ;;  %2133 = vrcp.f32 %v1879_v41 }
 0x203   :  { %2135 = vrcp.f32 %v1922_v19 }
 0x204   :  { %2061 = vset.pattern.permute.xlu1 %v3000_v39  ;;  %v2130_v39 = vpop.eup %2129 }
 0x205   :  { %1332 = vperm.xlu1 %2061, %v2126_v57  }
 0x206   :  { %v2132_v46 = vpop.eup %2131 }
 0x209   :  { %2062 = vset.pattern.permute.xlu1 %v2999_v35 }
 0x20a   :  { %1433 = vperm.xlu1 %2062, %v2128_v44  }
 0x20e   :  { %2063 = vset.pattern.permute.xlu1 %v3001_v59 }
 0x20f   :  { %1534 = vperm.xlu1 %2063, %v2130_v39   ;;  %v2134_v37 = vpop.eup %2133 }
 0x210   :  { %v2136_v42 = vpop.eup %2135 }
 0x213   :  { %2065 = vset.pattern.permute.xlu1 %v2217_v33  ;;  %v1141_v33 = vmax.f32 %v2307_v30, 0.0 }
 0x214   :  { %1736 = vperm.xlu1 %2065, %v2132_v46  }
 0x215   :  { %2137 = vrsqrt.f32 %v1141_v33  ;;  %vm1154_vm10 = vcmp.eq.f32.partialorder %v1141_v33, inf  ;;  %vm1156_vm11 = vcmp.eq.f32.partialorder %v1141_v33, 0.0 }
 0x216   :  { %2139 = vrsqrt.f32 %v1196_v40 }
 0x218   :  { %2067 = vset.pattern.permute.xlu1 %v2219_v16 }
 0x219   :  { %1895 = vperm.xlu1 %2067, %v2134_v37   ;;  %v1157_v37 = vand.u32 2147483648, %v1141_v33 }
 0x21d   :  { %1938 = vperm.xlu1 %2067, %v2136_v42  }
 0x222   :  { %v2138_v36 = vpop.eup %2137 }
 0x223   :  { %v1153_v25 = vmul.f32 %v2138_v36, %v1141_v33  ;;  %v2140_v43 = vpop.eup %2139  ;;  %v1171_v36 = vrot.slane %v2262_v61, %v2349_v63 }
 0x224   :  { %v1208_v46 = vmul.f32 %v2140_v43, %v1196_v40 }
 0x225   :  { %v1155_v39 = vsel %vm1154_vm10, %v1141_v33, %v1153_v25  ;;  %vm2856_vm10 = vmand %vm1298_vm8, %vm1299_vm9  ;;  %vm1904_vm9 = vcmp.ne.s32.totalorder %v2256_v51, 7 }
 0x226   :  { %vm1704_vm8 = vmand %vm1702_vm4, %vm1703_vm5 }
 0x230   :  { %v1036_v23 = vpop.xlane.xlu1 %1035 }
 0x231   :  { %v1037_v35 = vrot.slane %v1036_v23, 4 }
 0x233   :  { %v1038_v18 = vadd.f32 %v1037_v35, %v1036_v23  ;;  %v1158_v23 = vsel %vm1156_vm11, %v1157_v37, %v1155_v39  ;;  %v1688_v37 = vrot.slane %v2262_v61, %v2282_v20  ;;  %vm1399_vm11 = vcmp.ne.s32.totalorder %v2256_v51, 2 }
 0x234   :  { %v1046_v7 = vpop.xlane.xlu1 %1045 }
 0x235   :  { %v1039_v29 = vrot.slane %v1038_v18, 2  ;;  %v1047_v32 = vrot.slane %v1046_v7, 4 }
 0x237   :  { %v1048_v58 = vadd.f32 %v1047_v32, %v1046_v7  ;;  %v1040_v59 = vadd.f32 %v1039_v29, %v1038_v18  ;;  %v1210_v18 = vsel %vm1209_vm12, %v1196_v40, %v1208_v46  ;;  %v1212_v7 = vand.u32 2147483648, %v1196_v40 }
 0x238   :  { %v1159_v29 = vmax.f32 %v1158_v23, 1e-12  ;;  %v1587_v23 = vrot.slane %v2262_v61, %v2285_v21  ;;  %vm1400_vm12 = vcmp.ne.s32.totalorder %v2258_v52, 2 }
 0x239   :  { %v1049_v3 = vrot.slane %v1048_v58, 2  ;;  %v1041_v54 = vrot.slane %v1040_v59, 1  ;;  %vm2878_vm14 = vmand %vm1399_vm11, %vm1400_vm12 }
 0x23a   :  { %v2652_v31 = vpop.xlane.xlu1 %1098  ;;  %2141 = vrcp.f32 %v1159_v29 }
 0x23b   :  { %v1042_v55 = vadd.f32 %v1041_v54, %v1040_v59  ;;  %v1050_v62 = vadd.f32 %v1049_v3, %v1048_v58  ;;  %v1213_v58 = vsel %vm1211_vm13, %v1212_v7, %v1210_v18  ;;  %v1789_v7 = vrot.slane %v2262_v61, %v2288_v22 }
 0x23c   :  { %v2658_v45 = vpop.xlane.xlu0 %1088  ;;  %v1214_v3 = vmax.f32 %v1213_v58, 1e-12  ;;  %v1100_v46 = vrot.slane %v2652_v31, 4  ;;  %v1832_v58 = vrot.slane %v2270_v5, %v2288_v22 }
 0x23d   :  { %2000 = vpush %v1042_v55  ;;  %v1051_v9 = vrot.slane %v1050_v62, 1  ;;  %v1090_v18 = vrot.slane %v2658_v45, 4 }
 0x23e   :  { %v2655_v16 = vpop.permute.xlu1 %1164  ;;  %2143 = vrcp.f32 %v1214_v3  ;;  %v1101_v24 = vadd.f32 %v1100_v46, %v2652_v31 }
 0x23f   :  { %v1052_v13 = vadd.f32 %v1051_v9, %v1050_v62  ;;  %v1486_v9 = vrot.slane %v2262_v61, %v2378_v12  ;;  %v1091_v10 = vadd.f32 %v1090_v18, %v2658_v45 }
 0x241   :  { %2002 = vpush %v1052_v13 }
 0x242   :  { %v2660_v14 = vpop.permute.xlu1 %1219 }
 0x244   :  { %v2662_v57 = vpop.permute.xlu0 %1277 }
 0x246   :  { %v2664_v8 = vpop.permute.xlu1 %1378 }
 0x247   :  { %v2705_v29 = vpop.eup %2141 }
 0x248   :  { %v2666_v30 = vpop.permute.xlu0 %1320  ;;  %v1801_v45 = vrot.slane %v2705_v29, %v2288_v22 }
 0x24a   :  { %v2668_v48 = vpop.permute.xlu1 %1421 }
 0x24d   :  { %v1480_v41 = vpop.permute.xlu0 %1479 }
 0x24e   :  { %v1482_v33 = vsub.f32 %v2262_v61, %v1480_v41 }
 0x24f   :  { %v2670_v44 = vpop.permute.xlu1 %1522 }
 0x250   :  { %v1487_v25 = vsub.f32 %v1482_v33, %v1486_v9 }
 0x252   :  { %v1581_v19 = vpop.permute.xlu0 %1580  ;;  %v1488_v0 = vadd.f32 %v1487_v25, %v2395_v17  ;;  %v2730_v25 = vpop.eup %2143 }
 0x253   :  { %v1583_v41 = vsub.f32 %v2262_v61, %v1581_v19  ;;  %v1630_v19 = vrot.slane %v2270_v5, %v2285_v21  ;;  %v1642_v31 = vrot.slane %v2730_v25, %v2285_v21 }
 0x254   :  { %v1682_v42 = vpop.permute.xlu1 %1681 }
 0x255   :  { %v1684_v40 = vsub.f32 %v2262_v61, %v1682_v42  ;;  %v1226_v42 = vrot.slane %v2270_v5, %v2349_v63  ;;  %v1588_v50 = vsub.f32 %v1583_v41, %v1587_v23  ;;  %v1167_v41 = vsub.f32 %v2262_v61, %v2655_v16 }
 0x256   :  { %v1624_v35 = vpop.permute.xlu0 %1623 }
 0x257   :  { %v1689_v33 = vsub.f32 %v1684_v40, %v1688_v37  ;;  %v1626_v39 = vsub.f32 %v2270_v5, %v1624_v35  ;;  %v1498_v35 = vrot.slane %v2705_v29, %v2378_v12  ;;  %v1700_v40 = vrot.slane %v2705_v29, %v2282_v20 }
 0x258   :  { %v1172_v46 = vsub.f32 %v1167_v41, %v1171_v36 }
 0x259   :  { %v2672_v32 = vpop.permute.xlu1 %1825  ;;  %v1690_v23 = vadd.f32 %v1689_v33, %v2296_v26  ;;  %v1589_v33 = vadd.f32 %v1588_v50, %v2300_v27 }
 0x25a   :  { %v1828_v26 = vsub.f32 %v2270_v5, %v2672_v32  ;;  %v1092_v32 = vrot.slane %v1091_v10, 2 }
 0x25b   :  { %v2674_v59 = vpop.permute.xlu0 %1724 }
 0x25e   :  { %v2676_v54 = vpop.permute.xlu1 %1883 }
 0x260   :  { %v1783_v55 = vpop.permute.xlu0 %1782 }
 0x261   :  { %v1785_v3 = vsub.f32 %v2262_v61, %v1783_v55  ;;  %v1599_v55 = vrot.slane %v2705_v29, %v2285_v21  ;;  %v1102_v21 = vrot.slane %v1101_v24, 2 }
 0x262   :  { %v2678_v62 = vpop.permute.xlu1 %1926 }
 0x263   :  { %3003 = vst [vmem:[#allocation20_spill] sm:$0xff] %v2678_v62  ;;  %v1631_v62 = vsub.f32 %v1626_v39, %v1630_v19  ;;  %v1790_v6 = vsub.f32 %v1785_v3, %v1789_v7  ;;  %v1844_v39 = vrot.slane %v2730_v25, %v2288_v22 }
 0x265   :  { %v2683_v13 = vpop.permute.xlu0 %1176  ;;  %v1632_v22 = vadd.f32 %v1631_v62, %v2417_v47  ;;  %v1173_v47 = vadd.f32 %v1172_v46, %v2362_v2 }
 0x267   :  { %v2688_v43 = vpop.permute.xlu1 %1390  ;;  %v1179_v2 = vmul.f32 %v2683_v13, %v1173_v47 }
 0x26a   :  { %v2713_v9 = vpop.permute.xlu0 %1289 }
 0x26c   :  { %v1492_v37 = vpop.permute.xlu1 %1491 }
 0x26d   :  { %v1494_v17 = vmul.f32 %v1492_v37, %v1488_v0  ;;  %v1222_v37 = vsub.f32 %v2270_v5, %v2660_v14  ;;  %v1280_v14 = vsub.f32 %v2262_v61, %v2662_v57  ;;  %v1833_v57 = vsub.f32 %v1828_v26, %v1832_v58 }
 0x26e   :  { %s2758_s0 = spop %2000 }
 0x26f   :  { %v2741_v49 = vmul.f32 %v1498_v35, %v1494_v17  ;;  %v1694_v0 = vpop.permute.xlu0 %1693  ;;  %v1227_v36 = vsub.f32 %v1222_v37, %v1226_v42  ;;  %v2769_v17 = vld [vmem:[#allocation2] sm:$0xff]  ;;  %v1834_v58 = vadd.f32 %v1833_v57, %v2431_v53 }
 0x270   :  { %v1696_v16 = vmul.f32 %v1694_v0, %v1690_v23  ;;  %v1381_v41 = vsub.f32 %v2769_v17, %v2664_v8  ;;  %v1093_v23 = vadd.f32 %v1092_v32, %v1091_v10 }
 0x271   :  { %v1593_v60 = vpop.permute.xlu1 %1592 }
 0x272   :  { %v2760_v27 = vmul.f32 %v1700_v40, %v1696_v16  ;;  %v1595_v50 = vmul.f32 %v1593_v60, %v1589_v33  ;;  %s2003_s1 = spop %2002  ;;  %v1791_v40 = vadd.f32 %v1790_v6, %v2304_v28  ;;  %v3004_v60 = vrot.slane %v2262_v61, %v2375_v11 }
 0x273   :  { %v1054_v18 = vstv %s2003_s1  ;;  %v1323_v6 = vsub.f32 %v2270_v5, %v2666_v30  ;;  %v1228_v30 = vadd.f32 %v1227_v36, %v2446_v56  ;;  %v3007_v33 = vrot.slane %v2262_v61, %v2357_v1 }
 0x274   :  { %v1636_v7 = vpop.permute.xlu0 %1635  ;;  %v1600_v19 = vmul.f32 %v1599_v55, %v1595_v50  ;;  %2145 = vrcp.f32 %v1054_v18  ;;  %v1285_v35 = vsub.f32 %v1280_v14, %v3004_v60  ;;  %v1103_v55 = vadd.f32 %v1102_v21, %v1101_v24  ;;  %v2802_v14 = vld [vmem:[#allocation3] sm:$0xff] }
 0x275   :  { %v1638_v3 = vmul.f32 %v1636_v7, %v1632_v22  ;;  %v3008_v24 = vrot.slane %v2270_v5, %v2375_v11  ;;  %v1296_v56 = vrot.slane %v2705_v29, %v2375_v11  ;;  %v1238_v50 = vrot.slane %v2730_v25, %v2349_v63 }
 0x276   :  { %v1795_v28 = vpop.permute.xlu1 %1794  ;;  %v1604_v0 = vsel %vm2778_vm3, %v1600_v19, 0.0  ;;  %v1286_v13 = vadd.f32 %v1285_v35, %v2389_v15  ;;  %v3011_v22 = vrot.slane %v2705_v29, %v2349_v63  ;;  %v1094_v7 = vrot.slane %v1093_v23, 1 }
 0x277   :  { %v1643_v42 = vmul.f32 %v1642_v31, %v1638_v3  ;;  %v1797_v8 = vmul.f32 %v1795_v28, %v1791_v40  ;;  %v1386_v31 = vsub.f32 %v1381_v41, %v3007_v33  ;;  %v1328_v10 = vsub.f32 %v1323_v6, %v3008_v24 }
 0x278   :  { %v1184_v32 = vmul.f32 %v3011_v22, %v1179_v2  ;;  %v1104_v19 = vrot.slane %v1103_v55, 1  ;;  %v3014_v40 = vrot.slane %v2270_v5, %v2357_v1  ;;  %v1525_v35 = vsub.f32 %v2802_v14, %v2670_v44 }
 0x279   :  { %v1644_v37 = vsel %vm2778_vm3, %v1643_v42, 0.0  ;;  %v1802_v26 = vmul.f32 %v1801_v45, %v1797_v8  ;;  %v1838_v16 = vpop.permute.xlu0 %1837  ;;  %v1424_v45 = vsub.f32 %v2802_v14, %v2668_v48  ;;  %v1292_v48 = vmul.f32 %v2713_v9, %v1286_v13  ;;  %vm2903_vm3 = vmand %vm1500_vm15, %vm1501_vm1 }
 0x27a   :  { %v2797_v46 = vsub.f32 %v1604_v0, %v1644_v37  ;;  %v1840_v53 = vmul.f32 %v1838_v16, %v1834_v58  ;;  %v1387_v63 = vadd.f32 %v1386_v31, %v2367_v4  ;;  %v1329_v47 = vadd.f32 %v1328_v10, %v2461_v34 }
 0x27b   :  { %v1232_v21 = vpop.permute.xlu1 %1231  ;;  %v1806_v9 = vsel %vm2812_vm6, %v1802_v26, 0.0  ;;  %v1429_v60 = vsub.f32 %v1424_v45, %v3014_v40  ;;  %v1188_v4 = vsel %vm2826_vm7, %v1184_v32, 0.0  ;;  %v1297_v28 = vmul.f32 %v1296_v56, %v1292_v48 }
 0x27c   :  { %v1845_v36 = vmul.f32 %v1844_v39, %v1840_v53  ;;  %v1234_v57 = vmul.f32 %v1232_v21, %v1228_v30  ;;  %v1393_v62 = vmul.f32 %v2688_v43, %v1387_v63  ;;  %v1397_v8 = vrot.slane %v2705_v29, %v2357_v1 }
 0x27d   :  { %v1339_v43 = vrot.slane %v2730_v25, %v2375_v11  ;;  %v1095_v0 = vadd.f32 %v1094_v7, %v1093_v23  ;;  %v1105_v37 = vadd.f32 %v1104_v19, %v1103_v55  ;;  %v1727_v26 = vsub.f32 %v2802_v14, %v2674_v59 }
 0x27e   :  { %v1846_v39 = vsel %vm2812_vm6, %v1845_v36, 0.0  ;;  %v1239_v3 = vmul.f32 %v1238_v50, %v1234_v57  ;;  %v3017_v31 = vrot.slane %v2270_v5, %v2378_v12  ;;  %v1398_v11 = vmul.f32 %v1397_v8, %v1393_v62 }
 0x27f   :  { %v2842_v41 = vsub.f32 %v1806_v9, %v1846_v39  ;;  %v1301_v53 = vsel %vm2856_vm10, %v1297_v28, 0.0  ;;  %v1430_v24 = vadd.f32 %v1429_v60, %v2482_v38  ;;  %v1440_v38 = vrot.slane %v2730_v25, %v2357_v1  ;;  %v3021_v1 = vld [vmem:[#allocation17_spill] sm:$0xff] }
 0x280   :  { %v1240_v6 = vsel %vm2826_vm7, %v1239_v3, 0.0  ;;  %v1333_v42 = vpop.permute.xlu1 %1332  ;;  %v1530_v13 = vsub.f32 %v1525_v35, %v3017_v31  ;;  %v3020_v50 = vrot.slane %v2270_v5, %v2282_v20  ;;  %v1886_v22 = vsub.f32 %v2769_v17, %v2676_v54 }
 0x281   :  { %v1241_v34 = vsub.f32 %v1188_v4, %v1240_v6  ;;  %v1335_v2 = vmul.f32 %v1333_v42, %v1329_v47  ;;  %v2146_v58 = vpop.eup %2145  ;;  %v1402_v7 = vsel %vm2878_vm14, %v1398_v11, 0.0  ;;  %v1646_v5 = vand.u32 2147483647, %v2797_v46  ;;  %v3024_v47 = vld [vmem:[#allocation15_spill] sm:$0xff]  ;;  %v3026_v6 = vld [vmem:[#allocation18_spill] sm:$0xff] }
 0x282   :  { %2004 = vpush %v2146_v58  ;;  %v1732_v21 = vsub.f32 %v1727_v26, %v3020_v50  ;;  %v1531_v19 = vadd.f32 %v1530_v13, %v3021_v1  ;;  %v1648_v63 = vmul.f32 0.5, %v2797_v46  ;;  %v1541_v60 = vrot.slane %v2730_v25, %v2378_v12 }
 0x283   :  { %v1340_v16 = vmul.f32 %v1339_v43, %v1335_v2  ;;  %v1242_v30 = vand.u32 2147483647, %v1241_v34  ;;  %v1244_v33 = vmul.f32 0.5, %v1241_v34  ;;  %2006 = vpush %v1095_v0  ;;  %v3025_v4 = vrot.slane %v2262_v61, %v3024_v47  ;;  %v3027_v2 = vld [vmem:[#allocation20_spill] sm:$0xff] }
 0x284   :  { %2008 = vpush %v1105_v37  ;;  %v1733_v42 = vadd.f32 %v1732_v21, %v3026_v6  ;;  %v1929_v58 = vsub.f32 %v2802_v14, %v3027_v2  ;;  %v1503_v12 = vsel %vm2903_vm3, %v2741_v49, 0.0  ;;  %v1649_v61 = vmul.f32 %v1648_v63, %v2797_v46  ;;  %v3031_v21 = vld [vmem:[#allocation19_spill] sm:$0xff] }
 0x285   :  { %v1341_v23 = vsel %vm2856_vm10, %v1340_v16, 0.0  ;;  %v1434_v59 = vpop.permute.xlu1 %1433  ;;  %vm1243_vm13 = vcmp.lt.f32.partialorder %v1242_v30, 1.0  ;;  %v1245_v55 = vmul.f32 %v1244_v33, %v1241_v34  ;;  %v1992_v10 = vadd.f32 -0.5, %v1242_v30 }
 0x286   :  { %v1342_v56 = vsub.f32 %v1301_v53, %v1341_v23  ;;  %v1436_v15 = vmul.f32 %v1434_v59, %v1430_v24  ;;  %v1891_v62 = vsub.f32 %v1886_v22, %v3025_v4  ;;  %v1996_v0 = vadd.f32 -0.5, %v1646_v5 }
 0x287   :  { %v1247_v32 = vsel %vm1243_vm13, %v1245_v55, %v1992_v10  ;;  %v1743_v31 = vrot.slane %v2730_v25, %v2282_v20  ;;  %vm2928_vm7 = vcmp.lt.f32.partialorder %v1646_v5, 1.0  ;;  %v1933_v49 = vrot.slane %v2802_v14, %v3024_v47  ;;  %v3030_v20 = vld [vmem:[#allocation16_spill] sm:$0xff] }
 0x288   :  { %v1441_v48 = vmul.f32 %v1440_v38, %v1436_v15  ;;  %v1248_v36 = vsel %vm40_vm0, %v1247_v32, 0.0  ;;  %v1343_v57 = vand.u32 2147483647, %v1342_v56  ;;  %v1345_v18 = vmul.f32 0.5, %v1342_v56 }
 0x289   :  { %1249 = vadd.xlane.f32.xlu1 %v1248_v36  ;;  %v1934_v23 = vsub.f32 %v1929_v58, %v1933_v49  ;;  %v1892_v59 = vadd.f32 %v1891_v62, %v3030_v20  ;;  %v1651_v55 = vsel %vm2928_vm7, %v1649_v61, %v1996_v0  ;;  %v1705_v10 = vsel %vm1704_vm8, %v2760_v27, 0.0 }
 0x28a   :  { %v1442_v54 = vsel %vm2878_vm14, %v1441_v48, 0.0  ;;  %v1535_v17 = vpop.permute.xlu1 %1534  ;;  %vm1344_vm2 = vcmp.lt.f32.partialorder %v1343_v57, 1.0  ;;  %v1346_v9 = vmul.f32 %v1345_v18, %v1342_v56  ;;  %v1993_v39 = vadd.f32 -0.5, %v1343_v57 }
 0x28b   :  { %v1443_v40 = vsub.f32 %v1402_v7, %v1442_v54  ;;  %v1537_v35 = vmul.f32 %v1535_v17, %v1531_v19  ;;  %v1652_v15 = vsel %vm40_vm0, %v1651_v55, 0.0  ;;  %v1902_v50 = vrot.slane %v2705_v29, %v3024_v47 }
 0x28c   :  { %v1348_v28 = vsel %vm1344_vm2, %v1346_v9, %v1993_v39  ;;  %vm1905_vm10 = vcmp.ne.s32.totalorder %v2258_v52, 7  ;;  %v1935_v22 = vadd.f32 %v1934_v23, %v3031_v21  ;;  %v1945_v27 = vrot.slane %v2730_v25, %v3024_v47 }
 0x28d   :  { %v1542_v8 = vmul.f32 %v1541_v60, %v1537_v35  ;;  %v1349_v44 = vsel %vm40_vm0, %v1348_v28, 0.0  ;;  %v1444_v34 = vand.u32 2147483647, %v1443_v40  ;;  %v1446_v43 = vmul.f32 0.5, %v1443_v40  ;;  %vm1906_vm11 = vmand %vm1904_vm9, %vm1905_vm10  ;;  %v3033_v35 = vld [vmem:[#allocation14_spill] sm:$0xff] }
 0x28e   :  { %1350 = vadd.xlane.f32.xlu0 %v1349_v44  ;;  %v1848_v0 = vand.u32 2147483647, %v2842_v41 }
 0x28f   :  { %v1543_v37 = vsel %vm2903_vm3, %v1542_v8, 0.0  ;;  %v1737_v26 = vpop.permute.xlu1 %1736  ;;  %vm1445_vm6 = vcmp.lt.f32.partialorder %v1444_v34, 1.0  ;;  %v1447_v16 = vmul.f32 %v1446_v43, %v1443_v40  ;;  %v1994_v30 = vadd.f32 -0.5, %v1444_v34  ;;  %v3032_v40 = vld [vmem:[#allocation13_spill] sm:$0xff] }
 0x290   :  { %v2924_v33 = vsub.f32 %v1503_v12, %v1543_v37  ;;  %v1739_v13 = vmul.f32 %v1737_v26, %v1733_v42  ;;  %v1998_v11 = vadd.f32 -0.5, %v1848_v0  ;;  %vm1849_vm1 = vcmp.lt.f32.partialorder %v1848_v0, 1.0 }
 0x291   :  { %v1449_v46 = vsel %vm1445_vm6, %v1447_v16, %v1994_v30  ;;  %v1850_v30 = vmul.f32 0.5, %v2842_v41 }
 0x292   :  { %v1744_v53 = vmul.f32 %v1743_v31, %v1739_v13  ;;  %v1450_v24 = vsel %vm40_vm0, %v1449_v46, 0.0  ;;  %v1545_v4 = vand.u32 2147483647, %v2924_v33  ;;  %v1547_v62 = vmul.f32 0.5, %v2924_v33 }
 0x293   :  { %1451 = vadd.xlane.f32.xlu1 %v1450_v24  ;;  %v1851_v13 = vmul.f32 %v1850_v30, %v2842_v41 }
 0x294   :  { %v1745_v45 = vsel %vm1704_vm8, %v1744_v53, 0.0  ;;  %v1896_v14 = vpop.permute.xlu1 %1895  ;;  %v1548_v8 = vmul.f32 %v1547_v62, %v2924_v33  ;;  %v1995_v44 = vadd.f32 -0.5, %v1545_v4  ;;  %vm1546_vm14 = vcmp.lt.f32.partialorder %v1545_v4, 1.0 }
 0x295   :  { %v2943_v56 = vsub.f32 %v1705_v10, %v1745_v45  ;;  %v1898_v38 = vmul.f32 %v1896_v14, %v1892_v59  ;;  %v1853_v46 = vsel %vm1849_vm1, %v1851_v13, %v1998_v11 }
 0x296   :  { %v1550_v37 = vsel %vm1546_vm14, %v1548_v8, %v1995_v44  ;;  %v1854_v53 = vsel %vm40_vm0, %v1853_v46, 0.0 }
 0x297   :  { %1653 = vadd.xlane.f32.xlu1 %v1652_v15  ;;  %v1903_v48 = vmul.f32 %v1902_v50, %v1898_v38  ;;  %v1747_v34 = vand.u32 2147483647, %v2943_v56  ;;  %v1749_v58 = vmul.f32 0.5, %v2943_v56  ;;  %v1551_v33 = vsel %vm40_vm0, %v1550_v37, 0.0 }
 0x298   :  { %v1939_v32 = vpop.permute.xlu1 %1938 }
 0x299   :  { %v1941_v36 = vmul.f32 %v1939_v32, %v1935_v22  ;;  %v1907_v18 = vsel %vm1906_vm11, %v1903_v48, 0.0  ;;  %v1750_v26 = vmul.f32 %v1749_v58, %v2943_v56  ;;  %v1997_v16 = vadd.f32 -0.5, %v1747_v34 }
 0x29a   :  { %vm1748_vm15 = vcmp.lt.f32.partialorder %v1747_v34, 1.0 }
 0x29b   :  { %v1946_v57 = vmul.f32 %v1945_v27, %v1941_v36  ;;  %v1752_v31 = vsel %vm1748_vm15, %v1750_v26, %v1997_v16 }
 0x29c   :  { %v1753_v49 = vsel %vm40_vm0, %v1752_v31, 0.0 }
 0x29d   :  { %v1947_v7 = vsel %vm1906_vm11, %v1946_v57, 0.0 }
 0x29e   :  { %v1948_v1 = vsub.f32 %v1907_v18, %v1947_v7 }
 0x2a0   :  { %v1949_v29 = vand.u32 2147483647, %v1948_v1  ;;  %v1951_v19 = vmul.f32 0.5, %v1948_v1 }
 0x2a2   :  { %vm1950_vm12 = vcmp.lt.f32.partialorder %v1949_v29, 1.0  ;;  %v1952_v51 = vmul.f32 %v1951_v19, %v1948_v1  ;;  %v1999_v52 = vadd.f32 -0.5, %v1949_v29 }
 0x2a4   :  { %v1954_v5 = vsel %vm1950_vm12, %v1952_v51, %v1999_v52 }
 0x2a5   :  { %v1955_v63 = vsel %vm40_vm0, %v1954_v5, 0.0 }
 0x2a6   :  { %1956 = vadd.xlane.f32.xlu1 %v1955_v63 }
 0x2b3   :  { %s2005_s19 = spop %2004 }
 0x2b4   :  { %s2007_s20 = spop %2006  ;;  %s1057_s22 = smul.f32 %s2005_s19, %s2758_s0 }
 0x2b5   :  { %s2009_s21 = spop %2008 }
 0x2b6   :  { %v1107_v25 = vstv %s2009_s21  ;;  %v1058_v17 = vstv %s1057_s22 }
 0x2b7   :  { %2147 = vrcp.f32 %v1107_v25 }
 0x2b8   :  { %2149 = vrcp.f32 %v1058_v17 }
 0x2c4   :  { %v2148_v54 = vpop.eup %2147 }
 0x2c5   :  { %2010 = vpush %v2148_v54  ;;  %v2150_v39 = vpop.eup %2149 }
 0x2c6   :  { %v1060_v60 = vmul.f32 %v2150_v39, %v3032_v40 }
 0x2f6   :  { %s2011_s23 = spop %2010 }
 0x2f7   :  { %s1110_s24 = smul.f32 %s2011_s23, %s2007_s20 }
 0x2f9   :  { %v1111_v9 = vstv %s1110_s24 }
 0x2fa   :  { %2151 = vrcp.f32 %v1111_v9 }
 0x307   :  { %v2152_v3 = vpop.eup %2151 }
 0x308   :  { %v1113_v47 = vmul.f32 %v2152_v3, %v3033_v35 }
 0x30a   :  { %v1114_v28 = vsub.f32 %v1060_v60, %v1113_v47 }
 0x30c   :  { %v1115_v6 = vand.u32 2147483647, %v1114_v28  ;;  %v1117_v42 = vmul.f32 0.5, %v1114_v28 }
 0x30e   :  { %vm1116_vm13 = vcmp.lt.f32.partialorder %v1115_v6, 1.0  ;;  %v1118_v43 = vmul.f32 %v1117_v42, %v1114_v28  ;;  %v1991_v2 = vadd.f32 -0.5, %v1115_v6 }
 0x310   :  { %v1120_v12 = vsel %vm1116_vm13, %v1118_v43, %v1991_v2 }
 0x311   :  { %v1121_v61 = vsel %vm40_vm0, %v1120_v12, 0.0 }
 0x312   :  { %1122 = vadd.xlane.f32.xlu0 %v1121_v61  ;;  %v1250_v24 = vpop.xlane.xlu1 %1249 }
 0x313   :  { %v1251_v59 = vrot.slane %v1250_v24, 4 }
 0x315   :  { %v1252_v14 = vadd.f32 %v1251_v59, %v1250_v24 }
 0x316   :  { %1552 = vadd.xlane.f32.xlu0 %v1551_v33 }
 0x317   :  { %v1351_v20 = vpop.xlane.xlu0 %1350  ;;  %v1253_v15 = vrot.slane %v1252_v14, 2 }
 0x318   :  { %v1352_v55 = vrot.slane %v1351_v20, 4 }
 0x319   :  { %v1254_v1 = vadd.f32 %v1253_v15, %v1252_v14 }
 0x31a   :  { %1754 = vadd.xlane.f32.xlu0 %v1753_v49  ;;  %v1353_v38 = vadd.f32 %v1352_v55, %v1351_v20 }
 0x31b   :  { %v1255_v17 = vrot.slane %v1254_v1, 1 }
 0x31c   :  { %v1452_v23 = vpop.xlane.xlu1 %1451  ;;  %v1354_v22 = vrot.slane %v1353_v38, 2 }
 0x31d   :  { %v1453_v45 = vrot.slane %v1452_v23, 4  ;;  %v1256_v42 = vadd.f32 %v1255_v17, %v1254_v1 }
 0x31e   :  { %1855 = vadd.xlane.f32.xlu0 %v1854_v53  ;;  %v1355_v51 = vadd.f32 %v1354_v22, %v1353_v38 }
 0x31f   :  { %v1454_v41 = vadd.f32 %v1453_v45, %v1452_v23 }
 0x320   :  { %v1654_v10 = vpop.xlane.xlu1 %1653  ;;  %v1356_v60 = vrot.slane %v1355_v51, 1 }
 0x321   :  { %v1655_v56 = vrot.slane %v1654_v10, 4  ;;  %v1455_v27 = vrot.slane %v1454_v41, 2 }
 0x322   :  { %v1357_v43 = vadd.f32 %v1356_v60, %v1355_v51 }
 0x323   :  { %v1656_v50 = vadd.f32 %v1655_v56, %v1654_v10  ;;  %v1456_v52 = vadd.f32 %v1455_v27, %v1454_v41 }
 0x325   :  { %v1657_v57 = vrot.slane %v1656_v50, 2  ;;  %v1457_v35 = vrot.slane %v1456_v52, 1 }
 0x327   :  { %v1658_v9 = vadd.f32 %v1657_v57, %v1656_v50  ;;  %v1458_v58 = vadd.f32 %v1457_v35, %v1456_v52 }
 0x329   :  { %v1659_v8 = vrot.slane %v1658_v9, 1 }
 0x32b   :  { %v1660_v26 = vadd.f32 %v1659_v8, %v1658_v9 }
 0x32f   :  { %v1957_v32 = vpop.xlane.xlu1 %1956 }
 0x330   :  { %v1958_v18 = vrot.slane %v1957_v32, 4 }
 0x332   :  { %v1959_v25 = vadd.f32 %v1958_v18, %v1957_v32 }
 0x334   :  { %v1960_v28 = vrot.slane %v1959_v25, 2 }
 0x336   :  { %v1961_v37 = vadd.f32 %v1960_v28, %v1959_v25 }
 0x338   :  { %v1962_v13 = vrot.slane %v1961_v37, 1 }
 0x33a   :  { %v1963_v46 = vadd.f32 %v1962_v13, %v1961_v37 }
 0x39b   :  { %v1123_v21 = vpop.xlane.xlu0 %1122 }
 0x39c   :  { %v1124_v48 = vrot.slane %v1123_v21, 4 }
 0x39e   :  { %v1125_v36 = vadd.f32 %v1124_v48, %v1123_v21 }
 0x39f   :  { %v1553_v7 = vpop.xlane.xlu0 %1552 }
 0x3a0   :  { %v1126_v29 = vrot.slane %v1125_v36, 2  ;;  %v1554_v19 = vrot.slane %v1553_v7, 4 }
 0x3a2   :  { %v1555_v5 = vadd.f32 %v1554_v19, %v1553_v7  ;;  %v1127_v63 = vadd.f32 %v1126_v29, %v1125_v36 }
 0x3a3   :  { %v1755_v54 = vpop.xlane.xlu0 %1754 }
 0x3a4   :  { %v1556_v39 = vrot.slane %v1555_v5, 2  ;;  %v1756_v3 = vrot.slane %v1755_v54, 4  ;;  %v1128_v40 = vrot.slane %v1127_v63, 1 }
 0x3a6   :  { %v1757_v47 = vadd.f32 %v1756_v3, %v1755_v54  ;;  %v1129_v4 = vadd.f32 %v1128_v40, %v1127_v63  ;;  %v1557_v62 = vadd.f32 %v1556_v39, %v1555_v5 }
 0x3a7   :  { %v1856_v6 = vpop.xlane.xlu0 %1855 }
 0x3a8   :  { %v1758_v44 = vrot.slane %v1757_v47, 2  ;;  %v1857_v34 = vrot.slane %v1856_v6, 4  ;;  %2012 = vpush %v1129_v4  ;;  %v1558_v2 = vrot.slane %v1557_v62, 1 }
 0x3a9   :  { %2014 = vpush %v1256_v42 }
 0x3aa   :  { %v1858_v12 = vadd.f32 %v1857_v34, %v1856_v6  ;;  %2016 = vpush %v1357_v43  ;;  %v1559_v61 = vadd.f32 %v1558_v2, %v1557_v62  ;;  %v1759_v0 = vadd.f32 %v1758_v44, %v1757_v47 }
 0x3ab   :  { %2018 = vpush %v1458_v58 }
 0x3ac   :  { %v1859_v16 = vrot.slane %v1858_v12, 2  ;;  %2020 = vpush %v1559_v61  ;;  %v1760_v30 = vrot.slane %v1759_v0, 1 }
 0x3ad   :  { %2022 = vpush %v1660_v26 }
 0x3ae   :  { %v1860_v33 = vadd.f32 %v1859_v16, %v1858_v12  ;;  %v1761_v31 = vadd.f32 %v1760_v30, %v1759_v0 }
 0x3b0   :  { %2024 = vpush %v1761_v31  ;;  %v1861_v11 = vrot.slane %v1860_v33, 1 }
 0x3b2   :  { %v1862_v49 = vadd.f32 %v1861_v11, %v1860_v33 }
 0x3b4   :  { %2026 = vpush %v1862_v49 }
 0x3b5   :  { %2028 = vpush %v1963_v46 }
 0x3d9   :  { %s2013_s25 = spop %2012 }
 0x3da   :  { %s2015_s26 = spop %2014  ;;  %s1133_s11 = smul.f32 0.015625, %s2013_s25 }
 0x3db   :  { %s2017_s27 = spop %2016 }
 0x3dc   :  { %s1359_s28 = sadd.f32 %s2017_s27, %s2015_s26  ;;  %s2019_s29 = spop %2018 }
 0x3dd   :  { %s2021_s3 = spop %2020  ;;  %s1969_s15 = smul.f32 25.0, %s1133_s11 }
 0x3de   :  { %s1460_s30 = sadd.f32 %s2019_s29, %s1359_s28  ;;  %s2023_s5 = spop %2022 }
 0x3e0   :  { %s1561_s4 = sadd.f32 %s2021_s3, %s1460_s30 }
 0x3e1   :  { %s2025_s6 = spop %2024 }
 0x3e2   :  { %s1662_s7 = sadd.f32 %s2023_s5, %s1561_s4 }
 0x3e4   :  { %s1763_s8 = sadd.f32 %s2025_s6, %s1662_s7 }
 0x3e5   :  { %s2027_s9 = spop %2026 }
 0x3e6   :  { %s1864_s10 = sadd.f32 %s2027_s9, %s1763_s8  ;;  %s2029_s12 = spop %2028 }
 0x3e8   :  { %s1965_s13 = sadd.f32 %s2029_s12, %s1864_s10 }
 0x3ea   :  { %s1968_s14 = smul.f32 0.001953125, %s1965_s13 }
 0x3ec   :  { %s1970_s16 = smul.f32 50.0, %s1968_s14 }
 0x3ee   :  { %s1971_s17 = sadd.f32 %s1970_s16, %s1969_s15 }
 0x3f0   :  { %1973 = sst [smem:[#allocation9]] %s1971_s17 }
 0x3f1   :  { %1981 = dma.smem_to_hbm %s2220_s18, 16, %s2975_s2, [#allocation6]  }
 0x3f2   :  { %2207 = dma.done.wait [#allocation6], 16  }
 0x3f3   :  { %2208 = vsyncadd [#allocation6], 4294967280 }
 0x3f4   :  { %1985 = sfence }
 0x3f5   :  { %1986 = vsyncpa [#allocation5], 1 }
 0x3f6   :  { %1987 = vsyncpa [#allocation8], 1 }
 0x3f7   :  { %1988 = vsyncpa [#allocation6], 1 }

</bundles_post_ra>
